<compile_context>
chip_gen: v7x
topology: tpu7x:2x2x1
jax: 0.10.0
libtpu: 0.0.40
codegen_flags: <defaults>
</compile_context>

<pallas_src>
import jax
import jax.numpy as jnp
from jax import lax
from jax.experimental import pallas as pl
from jax.experimental.pallas import tpu as pltpu

_GROUP = 8  # sublane granularity for the recurrence store slabs


def _rnn_chunk_kernel(x_ref, w_ih_ref, w_hh_ref, b_rec_ref, w_out_ref, b_out_ref,
                      o_ref, h_carry, hx):
    """One (batch-block, time-chunk) grid step.

    x_ref:     (tb, tt, I)   input chunk (batch-first)
    w_ih_ref:  (I, H)        w_hh_ref: (H, H)
    b_rec_ref: (1, H)        combined b_ih + b_hh
    w_out_ref: (H, O)        b_out_ref: (1, O)
    o_ref:     (tb, tt, O)   output chunk
    h_carry:   (tb, H) f32   hidden state carried across time-grid steps
    hx:        (tb, tt, H) f32  holds the x-projection, overwritten in place by hiddens
    """
    tb, tt, I = x_ref.shape
    H = w_hh_ref.shape[0]
    O = w_out_ref.shape[1]

    # h0 = 0 at the start of every sequence (first time chunk of each batch block).
    @pl.when(pl.program_id(1) == 0)
    def _():
        h_carry[...] = jnp.zeros_like(h_carry)

    # ---- input projection: one sublane-dense MXU matmul for the whole chunk ----
    x2 = x_ref[...].reshape(tb * tt, I)
    xp = jnp.dot(x2, w_ih_ref[...], preferred_element_type=jnp.float32) + b_rec_ref[...]
    hx[...] = xp.reshape(tb, tt, H)          # park in scratch; frees vregs

    w_hh = w_hh_ref[...]

    def _run_steps(h, base, count):
        # Load one (tb, count, H) slab of pre-projected input, run `count` recurrence
        # steps in registers, store the hidden states back over the SAME slab with a
        # single sublane-dense store.
        xg = hx[:, pl.ds(base, count), :]
        hs = []
        for s in range(count):               # short static unroll (<= 8)
            h = jnp.maximum(
                xg[:, s, :] + jnp.dot(h, w_hh, preferred_element_type=jnp.float32),
                0.0)
            hs.append(h)
        hx[:, pl.ds(base, count), :] = jnp.stack(hs, axis=1)
        return h

    n_groups = tt // _GROUP
    rem = tt - n_groups * _GROUP

    h = h_carry[...]
    if n_groups > 0:
        def group_body(g, h):
            base = pl.multiple_of(g * _GROUP, _GROUP)
            return _run_steps(h, base, _GROUP)
        h = lax.fori_loop(0, n_groups, group_body, h, unroll=True)
    if rem > 0:                               # only when tt is not a multiple of 8
        h = _run_steps(h, n_groups * _GROUP, rem)
    h_carry[...] = h

    # ---- output projection + single slab store for the chunk ----
    h2 = hx[...].reshape(tb * tt, H)
    o2 = jnp.dot(h2, w_out_ref[...], preferred_element_type=jnp.float32) + b_out_ref[...]
    o_ref[...] = o2.reshape(tb, tt, O).astype(o_ref.dtype)
    # TODO(synk): for O < 128 a lane-dense (tb, tt*O) out block (+ wrapper reshape) would
    # turn this store from an 8/128-lane masked vst into an unmasked dense vst.


def _vmem_capacity_bytes():
    try:
        return int(pltpu.get_tpu_info().vmem_capacity_bytes)
    except Exception:
        return 64 * 1024 * 1024               # conservative: v7x per-core VMEM


def _pick_batch_chunk(B):
    # Split across the two v7x TensorCores only when each half stays a multiple of 8
    # sublanes; otherwise padding on the serial recurrence costs more than it gains.
    if B % 16 == 0:
        return B // 2
    return B


def _pick_time_chunk(T, tb, I, H, O, budget_bytes):
    """Largest time chunk that fits the VMEM budget; prefers multiples of 8 and exact
    divisors of T; capped at 256."""
    weight_bytes = 4 * (I * H + H * H + H * O + H + O)
    per_tt = 4 * tb * (2 * I + 2 * O + 2 * H)       # x/o double-buffered, hx scratch + xp
    fixed = 2 * weight_bytes + 4 * tb * H           # worst-case weights + carried h
    if budget_bytes > fixed:
        max_tt = max(8, (budget_bytes - fixed) // per_tt)
    else:
        max_tt = 8
    max_tt = int(min(max_tt, 256))
    if T <= max_tt:
        return T
    for tt in range(max_tt - max_tt % 8, 7, -8):    # multiple-of-8 divisor of T
        if T % tt == 0:
            return tt
    # No clean divisor: use a multiple-of-8 chunk; the last grid step is a padded
    # partial block (safe: padded rows never feed valid outputs, h_carry is re-zeroed
    # at the next sequence start).
    return max(8, max_tt - max_tt % 8)


def _rnn_pallas_call(B, T, I, H, O, tb, tt, vmem_limit, single_buffer_weights):
    def _const_spec(shape):
        idx = lambda b, t: (0,) * len(shape)
        if single_buffer_weights:
            return pl.BlockSpec(shape, idx, pipeline_mode=pl.Buffered(1))
        return pl.BlockSpec(shape, idx)

    grid = (pl.cdiv(B, tb), pl.cdiv(T, tt))
    return pl.pallas_call(
        _rnn_chunk_kernel,
        out_shape=jax.ShapeDtypeStruct((B, T, O), jnp.float32),
        grid_spec=pltpu.PrefetchScalarGridSpec(
            num_scalar_prefetch=0,
            grid=grid,
            in_specs=[
                pl.BlockSpec((tb, tt, I), lambda b, t: (b, t, 0)),   # x chunk (pipelined)
                _const_spec((I, H)),                                  # W_ih^T (invariant)
                _const_spec((H, H)),                                  # W_hh^T (invariant)
                _const_spec((1, H)),                                  # b_ih + b_hh
                _const_spec((H, O)),                                  # W_out^T
                _const_spec((1, O)),                                  # b_out
            ],
            out_specs=pl.BlockSpec((tb, tt, O), lambda b, t: (b, t, 0)),
            scratch_shapes=[
                pltpu.VMEM((tb, H), jnp.float32),       # carried hidden state
                pltpu.VMEM((tb, tt, H), jnp.float32),   # x-proj / hidden slab (in place)
            ],
        ),
        compiler_params=pltpu.CompilerParams(
            dimension_semantics=("parallel", "arbitrary"),
            vmem_limit_bytes=int(vmem_limit),
        ),
    )


def simple_rnn_forward(x, w_ih, w_hh, b_ih, b_hh, w_out, b_out):
    """x: (B, T, I) batch-first float32. Returns (B, T, O)."""
    B, T, I = x.shape
    H = w_hh.shape[0]
    O = w_out.shape[0]

    cap = _vmem_capacity_bytes()
    budget = int(cap * 0.75)                  # ~48 MiB on v7x, ~96 MiB on v5e/v6e
    tb = _pick_batch_chunk(B)
    tt = _pick_time_chunk(T, tb, I, H, O, budget)

    est = (2 * 4 * (I * H + H * H + H * O + H + O)
           + 4 * tb * tt * (2 * I + 2 * O + 2 * H) + 4 * tb * H)
    vmem_limit = min(budget, max(32 * 1024 * 1024, 2 * est))

    b_rec = (b_ih + b_hh).reshape(1, H)       # fold both biases into the x-projection
    args = (x, w_ih.T, w_hh.T, b_rec, w_out.T, b_out.reshape(1, O))

    try:
        return _rnn_pallas_call(B, T, I, H, O, tb, tt, vmem_limit,
                                single_buffer_weights=True)(*args)
    except Exception:
        # pipeline_mode=pl.Buffered(1) unsupported on this jax build: fall back to the
        # default double-buffered invariant operands (correctness unaffected).
        return _rnn_pallas_call(B, T, I, H, O, tb, tt, vmem_limit,
                                single_buffer_weights=False)(*args)


def _reference(x, w_ih, w_hh, b_ih, b_hh, w_out, b_out):
    """Pure-JAX reference mirroring torch semantics (h0 = 0)."""
    def step(h, x_t):
        h = jax.nn.relu(x_t @ w_ih.T + b_ih + h @ w_hh.T + b_hh)
        return h, h
    B = x.shape[0]
    H = w_hh.shape[0]
    _, hs = lax.scan(step, jnp.zeros((B, H), jnp.float32),
                     jnp.transpose(x, (1, 0, 2)))
    hs = jnp.transpose(hs, (1, 0, 2))                    # (B, T, H)
    return hs @ w_out.T + b_out


if __name__ == "__main__":
    B, T = 2, 8
    INPUT_SIZE, HIDDEN_SIZE, OUTPUT_SIZE = 16, 32, 8

    key = jax.random.PRNGKey(0)
    kx, k1, k2, k3, k4, k5, k6 = jax.random.split(key, 7)

    scale_rnn = 1.0 / jnp.sqrt(HIDDEN_SIZE)   # torch.nn.RNN default init range
    scale_lin = 1.0 / jnp.sqrt(HIDDEN_SIZE)   # torch.nn.Linear default init range

    x = jax.random.normal(kx, (B, T, INPUT_SIZE), jnp.float32)
    w_ih = jax.random.uniform(k1, (HIDDEN_SIZE, INPUT_SIZE), jnp.float32,
                              -scale_rnn, scale_rnn)
    w_hh = jax.random.uniform(k2, (HIDDEN_SIZE, HIDDEN_SIZE), jnp.float32,
                              -scale_rnn, scale_rnn)
    b_ih = jax.random.uniform(k3, (HIDDEN_SIZE,), jnp.float32, -scale_rnn, scale_rnn)
    b_hh = jax.random.uniform(k4, (HIDDEN_SIZE,), jnp.float32, -scale_rnn, scale_rnn)
    w_out = jax.random.uniform(k5, (OUTPUT_SIZE, HIDDEN_SIZE), jnp.float32,
                               -scale_lin, scale_lin)
    b_out = jax.random.uniform(k6, (OUTPUT_SIZE,), jnp.float32, -scale_lin, scale_lin)

    out = simple_rnn_forward(x, w_ih, w_hh, b_ih, b_hh, w_out, b_out)
    out = jax.block_until_ready(out)

    ref = _reference(x, w_ih, w_hh, b_ih, b_hh, w_out, b_out)
    assert out.shape == (B, T, OUTPUT_SIZE)
    assert jnp.allclose(out, ref, atol=1e-5, rtol=1e-5), "mismatch vs JAX reference"

    print("KERNEL_OK")
</pallas_src>

<mosaic_0001>
module attributes {stable_mosaic.version = 11 : i64} {
  func.func @_rnn_chunk_kernel(%arg0: i32, %arg1: i32, %arg2: memref<2x8x16xf32, #tpu.memory_space<vmem>>, %arg3: memref<16x32xf32, #tpu.memory_space<vmem>>, %arg4: memref<32x32xf32, #tpu.memory_space<vmem>>, %arg5: memref<1x32xf32, #tpu.memory_space<vmem>>, %arg6: memref<32x8xf32, #tpu.memory_space<vmem>>, %arg7: memref<1x8xf32, #tpu.memory_space<vmem>>, %arg8: memref<2x8x8xf32, #tpu.memory_space<vmem>>, %arg9: memref<2x32xf32, #tpu.memory_space<vmem>>, %arg10: memref<2x8x32xf32, #tpu.memory_space<vmem>>) attributes {dimension_semantics = [#tpu.dimension_semantics<parallel>, #tpu.dimension_semantics<arbitrary>], iteration_bounds = array<i64: 1, 1>, scalar_prefetch = 0 : i64, scratch_operands = 2 : i64, tpu.core_type = #tpu.core_type<tc>, window_params = [{transform_indices = @transform_0, window_bounds = array<i64: 2, 8, 16>}, {pipeline_mode = #tpu.pipeline_mode<synchronous>, transform_indices = @transform_1, window_bounds = array<i64: 16, 32>}, {pipeline_mode = #tpu.pipeline_mode<synchronous>, transform_indices = @transform_2, window_bounds = array<i64: 32, 32>}, {pipeline_mode = #tpu.pipeline_mode<synchronous>, transform_indices = @transform_3, window_bounds = array<i64: 1, 32>}, {pipeline_mode = #tpu.pipeline_mode<synchronous>, transform_indices = @transform_4, window_bounds = array<i64: 32, 8>}, {pipeline_mode = #tpu.pipeline_mode<synchronous>, transform_indices = @transform_5, window_bounds = array<i64: 1, 8>}, {transform_indices = @transform_6, window_bounds = array<i64: 2, 8, 8>}]} {
    %c0_i32 = arith.constant 0 : i32
    %0 = arith.cmpi eq, %arg1, %c0_i32 : i32
    %1 = arith.extui %0 : i1 to i32
    %c0_i32_0 = arith.constant 0 : i32
    %2 = arith.cmpi ne, %1, %c0_i32_0 : i32
    scf.if %2 {
      %cst_48 = arith.constant 0.000000e+00 : f32
      %87 = vector.broadcast %cst_48 : f32 to vector<2x32xf32>
      %c0_49 = arith.constant 0 : index
      %c0_50 = arith.constant 0 : index
      %88 = vector.load %arg9[%c0_49, %c0_50] : memref<2x32xf32, #tpu.memory_space<vmem>>, vector<2x32xf32>
      tpu.vector_store %arg9[%c0_49, %c0_50], %87 {strides = array<i32>} : memref<2x32xf32, #tpu.memory_space<vmem>>, vector<2x32xf32>,
    } else {
    }
    %c0 = arith.constant 0 : index
    %c0_1 = arith.constant 0 : index
    %c0_2 = arith.constant 0 : index
    %3 = vector.load %arg2[%c0, %c0_1, %c0_2] : memref<2x8x16xf32, #tpu.memory_space<vmem>>, vector<2x8x16xf32>
    %4 = vector.shape_cast %3 : vector<2x8x16xf32> to vector<16x16xf32>
    %c0_3 = arith.constant 0 : index
    %c0_4 = arith.constant 0 : index
    %5 = vector.load %arg3[%c0_3, %c0_4] : memref<16x32xf32, #tpu.memory_space<vmem>>, vector<16x32xf32>
    %cst = arith.constant dense<0.000000e+00> : vector<16x32xf32>
    %6 = tpu.matmul %4, %5, %cst {dimension_numbers = #tpu.dot_dimension_numbers<[1], [0], [0], [1], [0, 0, 1, 1], [], []>} : vector<16x16xf32>, vector<16x32xf32>, vector<16x32xf32> -> vector<16x32xf32>
    %c0_5 = arith.constant 0 : index
    %c0_6 = arith.constant 0 : index
    %7 = vector.load %arg5[%c0_5, %c0_6] : memref<1x32xf32, #tpu.memory_space<vmem>>, vector<1x32xf32>
    %8 = vector.broadcast %7 : vector<1x32xf32> to vector<16x32xf32>
    %9 = arith.addf %6, %8 : vector<16x32xf32>
    %10 = vector.shape_cast %9 : vector<16x32xf32> to vector<2x8x32xf32>
    %c0_7 = arith.constant 0 : index
    %c0_8 = arith.constant 0 : index
    %c0_9 = arith.constant 0 : index
    %11 = vector.load %arg10[%c0_7, %c0_8, %c0_9] : memref<2x8x32xf32, #tpu.memory_space<vmem>>, vector<2x8x32xf32>
    tpu.vector_store %arg10[%c0_7, %c0_8, %c0_9], %10 {strides = array<i32>} : memref<2x8x32xf32, #tpu.memory_space<vmem>>, vector<2x8x32xf32>,
    %c0_10 = arith.constant 0 : index
    %c0_11 = arith.constant 0 : index
    %12 = vector.load %arg4[%c0_10, %c0_11] : memref<32x32xf32, #tpu.memory_space<vmem>>, vector<32x32xf32>
    %c0_12 = arith.constant 0 : index
    %c0_13 = arith.constant 0 : index
    %13 = vector.load %arg9[%c0_12, %c0_13] : memref<2x32xf32, #tpu.memory_space<vmem>>, vector<2x32xf32>
    %c0_i32_14 = arith.constant 0 : i32
    %c8_i32 = arith.constant 8 : i32
    %14 = arith.muli %c0_i32_14, %c8_i32 : i32
    %15 = tpu.assume_multiple %14, 8 : i32
    %c0_15 = arith.constant 0 : index
    %16 = arith.index_cast %15 : i32 to index
    %c0_16 = arith.constant 0 : index
    %17 = vector.load %arg10[%c0_15, %16, %c0_16] : memref<2x8x32xf32, #tpu.memory_space<vmem>>, vector<2x8x32xf32>
    %18 = vector.extract_strided_slice %17 {offsets = [0, 0, 0], sizes = [2, 1, 32], strides = [1, 1, 1]} : vector<2x8x32xf32> to vector<2x1x32xf32>
    %19 = vector.shape_cast %18 : vector<2x1x32xf32> to vector<2x32xf32>
    %cst_17 = arith.constant dense<0.000000e+00> : vector<2x32xf32>
    %20 = tpu.matmul %13, %12, %cst_17 {dimension_numbers = #tpu.dot_dimension_numbers<[1], [0], [0], [1], [0, 0, 1, 1], [], []>} : vector<2x32xf32>, vector<32x32xf32>, vector<2x32xf32> -> vector<2x32xf32>
    %21 = arith.addf %19, %20 : vector<2x32xf32>
    %cst_18 = arith.constant 0.000000e+00 : f32
    %22 = vector.broadcast %cst_18 : f32 to vector<2x32xf32>
    %23 = arith.maximumf %21, %22 : vector<2x32xf32>
    %24 = vector.extract_strided_slice %17 {offsets = [0, 1, 0], sizes = [2, 1, 32], strides = [1, 1, 1]} : vector<2x8x32xf32> to vector<2x1x32xf32>
    %25 = vector.shape_cast %24 : vector<2x1x32xf32> to vector<2x32xf32>
    %cst_19 = arith.constant dense<0.000000e+00> : vector<2x32xf32>
    %26 = tpu.matmul %23, %12, %cst_19 {dimension_numbers = #tpu.dot_dimension_numbers<[1], [0], [0], [1], [0, 0, 1, 1], [], []>} : vector<2x32xf32>, vector<32x32xf32>, vector<2x32xf32> -> vector<2x32xf32>
    %27 = arith.addf %25, %26 : vector<2x32xf32>
    %cst_20 = arith.constant 0.000000e+00 : f32
    %28 = vector.broadcast %cst_20 : f32 to vector<2x32xf32>
    %29 = arith.maximumf %27, %28 : vector<2x32xf32>
    %30 = vector.extract_strided_slice %17 {offsets = [0, 2, 0], sizes = [2, 1, 32], strides = [1, 1, 1]} : vector<2x8x32xf32> to vector<2x1x32xf32>
    %31 = vector.shape_cast %30 : vector<2x1x32xf32> to vector<2x32xf32>
    %cst_21 = arith.constant dense<0.000000e+00> : vector<2x32xf32>
    %32 = tpu.matmul %29, %12, %cst_21 {dimension_numbers = #tpu.dot_dimension_numbers<[1], [0], [0], [1], [0, 0, 1, 1], [], []>} : vector<2x32xf32>, vector<32x32xf32>, vector<2x32xf32> -> vector<2x32xf32>
    %33 = arith.addf %31, %32 : vector<2x32xf32>
    %cst_22 = arith.constant 0.000000e+00 : f32
    %34 = vector.broadcast %cst_22 : f32 to vector<2x32xf32>
    %35 = arith.maximumf %33, %34 : vector<2x32xf32>
    %36 = vector.extract_strided_slice %17 {offsets = [0, 3, 0], sizes = [2, 1, 32], strides = [1, 1, 1]} : vector<2x8x32xf32> to vector<2x1x32xf32>
    %37 = vector.shape_cast %36 : vector<2x1x32xf32> to vector<2x32xf32>
    %cst_23 = arith.constant dense<0.000000e+00> : vector<2x32xf32>
    %38 = tpu.matmul %35, %12, %cst_23 {dimension_numbers = #tpu.dot_dimension_numbers<[1], [0], [0], [1], [0, 0, 1, 1], [], []>} : vector<2x32xf32>, vector<32x32xf32>, vector<2x32xf32> -> vector<2x32xf32>
    %39 = arith.addf %37, %38 : vector<2x32xf32>
    %cst_24 = arith.constant 0.000000e+00 : f32
    %40 = vector.broadcast %cst_24 : f32 to vector<2x32xf32>
    %41 = arith.maximumf %39, %40 : vector<2x32xf32>
    %42 = vector.extract_strided_slice %17 {offsets = [0, 4, 0], sizes = [2, 1, 32], strides = [1, 1, 1]} : vector<2x8x32xf32> to vector<2x1x32xf32>
    %43 = vector.shape_cast %42 : vector<2x1x32xf32> to vector<2x32xf32>
    %cst_25 = arith.constant dense<0.000000e+00> : vector<2x32xf32>
    %44 = tpu.matmul %41, %12, %cst_25 {dimension_numbers = #tpu.dot_dimension_numbers<[1], [0], [0], [1], [0, 0, 1, 1], [], []>} : vector<2x32xf32>, vector<32x32xf32>, vector<2x32xf32> -> vector<2x32xf32>
    %45 = arith.addf %43, %44 : vector<2x32xf32>
    %cst_26 = arith.constant 0.000000e+00 : f32
    %46 = vector.broadcast %cst_26 : f32 to vector<2x32xf32>
    %47 = arith.maximumf %45, %46 : vector<2x32xf32>
    %48 = vector.extract_strided_slice %17 {offsets = [0, 5, 0], sizes = [2, 1, 32], strides = [1, 1, 1]} : vector<2x8x32xf32> to vector<2x1x32xf32>
    %49 = vector.shape_cast %48 : vector<2x1x32xf32> to vector<2x32xf32>
    %cst_27 = arith.constant dense<0.000000e+00> : vector<2x32xf32>
    %50 = tpu.matmul %47, %12, %cst_27 {dimension_numbers = #tpu.dot_dimension_numbers<[1], [0], [0], [1], [0, 0, 1, 1], [], []>} : vector<2x32xf32>, vector<32x32xf32>, vector<2x32xf32> -> vector<2x32xf32>
    %51 = arith.addf %49, %50 : vector<2x32xf32>
    %cst_28 = arith.constant 0.000000e+00 : f32
    %52 = vector.broadcast %cst_28 : f32 to vector<2x32xf32>
    %53 = arith.maximumf %51, %52 : vector<2x32xf32>
    %54 = vector.extract_strided_slice %17 {offsets = [0, 6, 0], sizes = [2, 1, 32], strides = [1, 1, 1]} : vector<2x8x32xf32> to vector<2x1x32xf32>
    %55 = vector.shape_cast %54 : vector<2x1x32xf32> to vector<2x32xf32>
    %cst_29 = arith.constant dense<0.000000e+00> : vector<2x32xf32>
    %56 = tpu.matmul %53, %12, %cst_29 {dimension_numbers = #tpu.dot_dimension_numbers<[1], [0], [0], [1], [0, 0, 1, 1], [], []>} : vector<2x32xf32>, vector<32x32xf32>, vector<2x32xf32> -> vector<2x32xf32>
    %57 = arith.addf %55, %56 : vector<2x32xf32>
    %cst_30 = arith.constant 0.000000e+00 : f32
    %58 = vector.broadcast %cst_30 : f32 to vector<2x32xf32>
    %59 = arith.maximumf %57, %58 : vector<2x32xf32>
    %60 = vector.extract_strided_slice %17 {offsets = [0, 7, 0], sizes = [2, 1, 32], strides = [1, 1, 1]} : vector<2x8x32xf32> to vector<2x1x32xf32>
    %61 = vector.shape_cast %60 : vector<2x1x32xf32> to vector<2x32xf32>
    %cst_31 = arith.constant dense<0.000000e+00> : vector<2x32xf32>
    %62 = tpu.matmul %59, %12, %cst_31 {dimension_numbers = #tpu.dot_dimension_numbers<[1], [0], [0], [1], [0, 0, 1, 1], [], []>} : vector<2x32xf32>, vector<32x32xf32>, vector<2x32xf32> -> vector<2x32xf32>
    %63 = arith.addf %61, %62 : vector<2x32xf32>
    %cst_32 = arith.constant 0.000000e+00 : f32
    %64 = vector.broadcast %cst_32 : f32 to vector<2x32xf32>
    %65 = arith.maximumf %63, %64 : vector<2x32xf32>
    %66 = vector.shape_cast %23 : vector<2x32xf32> to vector<2x1x32xf32>
    %67 = vector.shape_cast %29 : vector<2x32xf32> to vector<2x1x32xf32>
    %68 = vector.shape_cast %35 : vector<2x32xf32> to vector<2x1x32xf32>
    %69 = vector.shape_cast %41 : vector<2x32xf32> to vector<2x1x32xf32>
    %70 = vector.shape_cast %47 : vector<2x32xf32> to vector<2x1x32xf32>
    %71 = vector.shape_cast %53 : vector<2x32xf32> to vector<2x1x32xf32>
    %72 = vector.shape_cast %59 : vector<2x32xf32> to vector<2x1x32xf32>
    %73 = vector.shape_cast %65 : vector<2x32xf32> to vector<2x1x32xf32>
    %74 = tpu.concatenate %66, %67, %68, %69, %70, %71, %72, %73 in 1 : vector<2x1x32xf32>, vector<2x1x32xf32>, vector<2x1x32xf32>, vector<2x1x32xf32>, vector<2x1x32xf32>, vector<2x1x32xf32>, vector<2x1x32xf32>, vector<2x1x32xf32> -> vector<2x8x32xf32>
    %c0_33 = arith.constant 0 : index
    %75 = arith.index_cast %15 : i32 to index
    %c0_34 = arith.constant 0 : index
    %76 = vector.load %arg10[%c0_33, %75, %c0_34] : memref<2x8x32xf32, #tpu.memory_space<vmem>>, vector<2x8x32xf32>
    tpu.vector_store %arg10[%c0_33, %75, %c0_34], %74 {strides = array<i32>} : memref<2x8x32xf32, #tpu.memory_space<vmem>>, vector<2x8x32xf32>,
    %c1_i32 = arith.constant 1 : i32
    %c0_35 = arith.constant 0 : index
    %c0_36 = arith.constant 0 : index
    %77 = vector.load %arg9[%c0_35, %c0_36] : memref<2x32xf32, #tpu.memory_space<vmem>>, vector<2x32xf32>
    tpu.vector_store %arg9[%c0_35, %c0_36], %65 {strides = array<i32>} : memref<2x32xf32, #tpu.memory_space<vmem>>, vector<2x32xf32>,
    %c0_37 = arith.constant 0 : index
    %c0_38 = arith.constant 0 : index
    %c0_39 = arith.constant 0 : index
    %78 = vector.load %arg10[%c0_37, %c0_38, %c0_39] : memref<2x8x32xf32, #tpu.memory_space<vmem>>, vector<2x8x32xf32>
    %79 = vector.shape_cast %78 : vector<2x8x32xf32> to vector<16x32xf32>
    %c0_40 = arith.constant 0 : index
    %c0_41 = arith.constant 0 : index
    %80 = vector.load %arg6[%c0_40, %c0_41] : memref<32x8xf32, #tpu.memory_space<vmem>>, vector<32x8xf32>
    %cst_42 = arith.constant dense<0.000000e+00> : vector<16x8xf32>
    %81 = tpu.matmul %79, %80, %cst_42 {dimension_numbers = #tpu.dot_dimension_numbers<[1], [0], [0], [1], [0, 0, 1, 1], [], []>} : vector<16x32xf32>, vector<32x8xf32>, vector<16x8xf32> -> vector<16x8xf32>
    %c0_43 = arith.constant 0 : index
    %c0_44 = arith.constant 0 : index
    %82 = vector.load %arg7[%c0_43, %c0_44] : memref<1x8xf32, #tpu.memory_space<vmem>>, vector<1x8xf32>
    %83 = vector.broadcast %82 : vector<1x8xf32> to vector<16x8xf32>
    %84 = arith.addf %81, %83 : vector<16x8xf32>
    %85 = vector.shape_cast %84 : vector<16x8xf32> to vector<2x8x8xf32>
    %c0_45 = arith.constant 0 : index
    %c0_46 = arith.constant 0 : index
    %c0_47 = arith.constant 0 : index
    %86 = vector.load %arg8[%c0_45, %c0_46, %c0_47] : memref<2x8x8xf32, #tpu.memory_space<vmem>>, vector<2x8x8xf32>
    tpu.vector_store %arg8[%c0_45, %c0_46, %c0_47], %85 {strides = array<i32>} : memref<2x8x8xf32, #tpu.memory_space<vmem>>, vector<2x8x8xf32>,
    return
  }
  func.func @transform_0(%arg0: i32, %arg1: i32) -> (i32, i32, i32) {
    %c0_i32 = arith.constant 0 : i32
    %c0_i32_0 = arith.constant 0 : i32
    return %arg0, %arg1, %c0_i32 : i32, i32, i32
  }
  func.func @transform_1(%arg0: i32, %arg1: i32) -> (i32, i32) {
    %c0_i32 = arith.constant 0 : i32
    %c0_i32_0 = arith.constant 0 : i32
    %c0_i32_1 = arith.constant 0 : i32
    return %c0_i32, %c0_i32_0 : i32, i32
  }
  func.func @transform_2(%arg0: i32, %arg1: i32) -> (i32, i32) {
    %c0_i32 = arith.constant 0 : i32
    %c0_i32_0 = arith.constant 0 : i32
    %c0_i32_1 = arith.constant 0 : i32
    return %c0_i32, %c0_i32_0 : i32, i32
  }
  func.func @transform_3(%arg0: i32, %arg1: i32) -> (i32, i32) {
    %c0_i32 = arith.constant 0 : i32
    %c0_i32_0 = arith.constant 0 : i32
    %c0_i32_1 = arith.constant 0 : i32
    return %c0_i32, %c0_i32_0 : i32, i32
  }
  func.func @transform_4(%arg0: i32, %arg1: i32) -> (i32, i32) {
    %c0_i32 = arith.constant 0 : i32
    %c0_i32_0 = arith.constant 0 : i32
    %c0_i32_1 = arith.constant 0 : i32
    return %c0_i32, %c0_i32_0 : i32, i32
  }
  func.func @transform_5(%arg0: i32, %arg1: i32) -> (i32, i32) {
    %c0_i32 = arith.constant 0 : i32
    %c0_i32_0 = arith.constant 0 : i32
    %c0_i32_1 = arith.constant 0 : i32
    return %c0_i32, %c0_i32_0 : i32, i32
  }
  func.func @transform_6(%arg0: i32, %arg1: i32) -> (i32, i32, i32) {
    %c0_i32 = arith.constant 0 : i32
    %c0_i32_0 = arith.constant 0 : i32
    return %arg0, %arg1, %c0_i32 : i32, i32, i32
  }
}

module attributes {stable_mosaic.version = 11 : i64} {
  func.func @_rnn_chunk_kernel(%arg0: i32, %arg1: i32, %arg2: memref<2x8x16xf32, #tpu.memory_space<vmem>>, %arg3: memref<16x32xf32, #tpu.memory_space<vmem>>, %arg4: memref<32x32xf32, #tpu.memory_space<vmem>>, %arg5: memref<1x32xf32, #tpu.memory_space<vmem>>, %arg6: memref<32x8xf32, #tpu.memory_space<vmem>>, %arg7: memref<1x8xf32, #tpu.memory_space<vmem>>, %arg8: memref<2x8x8xf32, #tpu.memory_space<vmem>>, %arg9: memref<2x32xf32, #tpu.memory_space<vmem>>, %arg10: memref<2x8x32xf32, #tpu.memory_space<vmem>>) attributes {dimension_semantics = [#tpu.dimension_semantics<parallel>, #tpu.dimension_semantics<arbitrary>], iteration_bounds = array<i64: 1, 1>, scalar_prefetch = 0 : i64, scratch_operands = 2 : i64, tpu.core_type = #tpu.core_type<tc>, window_params = [{transform_indices = @transform_0, window_bounds = array<i64: 2, 8, 16>}, {pipeline_mode = #tpu.pipeline_mode<synchronous>, transform_indices = @transform_1, window_bounds = array<i64: 16, 32>}, {pipeline_mode = #tpu.pipeline_mode<synchronous>, transform_indices = @transform_2, window_bounds = array<i64: 32, 32>}, {pipeline_mode = #tpu.pipeline_mode<synchronous>, transform_indices = @transform_3, window_bounds = array<i64: 1, 32>}, {pipeline_mode = #tpu.pipeline_mode<synchronous>, transform_indices = @transform_4, window_bounds = array<i64: 32, 8>}, {pipeline_mode = #tpu.pipeline_mode<synchronous>, transform_indices = @transform_5, window_bounds = array<i64: 1, 8>}, {transform_indices = @transform_6, window_bounds = array<i64: 2, 8, 8>}]} {
    %c0_i32 = arith.constant 0 : i32
    %0 = arith.cmpi eq, %arg1, %c0_i32 : i32
    %1 = arith.extui %0 : i1 to i32
    %c0_i32_0 = arith.constant 0 : i32
    %2 = arith.cmpi ne, %1, %c0_i32_0 : i32
    scf.if %2 {
      %cst_48 = arith.constant 0.000000e+00 : f32
      %87 = vector.broadcast %cst_48 : f32 to vector<2x32xf32>
      %c0_49 = arith.constant 0 : index
      %c0_50 = arith.constant 0 : index
      %88 = vector.load %arg9[%c0_49, %c0_50] : memref<2x32xf32, #tpu.memory_space<vmem>>, vector<2x32xf32>
      tpu.vector_store %arg9[%c0_49, %c0_50], %87 {strides = array<i32>} : memref<2x32xf32, #tpu.memory_space<vmem>>, vector<2x32xf32>,
    } else {
    }
    %c0 = arith.constant 0 : index
    %c0_1 = arith.constant 0 : index
    %c0_2 = arith.constant 0 : index
    %3 = vector.load %arg2[%c0, %c0_1, %c0_2] : memref<2x8x16xf32, #tpu.memory_space<vmem>>, vector<2x8x16xf32>
    %4 = vector.shape_cast %3 : vector<2x8x16xf32> to vector<16x16xf32>
    %c0_3 = arith.constant 0 : index
    %c0_4 = arith.constant 0 : index
    %5 = vector.load %arg3[%c0_3, %c0_4] : memref<16x32xf32, #tpu.memory_space<vmem>>, vector<16x32xf32>
    %cst = arith.constant dense<0.000000e+00> : vector<16x32xf32>
    %6 = tpu.matmul %4, %5, %cst {dimension_numbers = #tpu.dot_dimension_numbers<[1], [0], [0], [1], [0, 0, 1, 1], [], []>} : vector<16x16xf32>, vector<16x32xf32>, vector<16x32xf32> -> vector<16x32xf32>
    %c0_5 = arith.constant 0 : index
    %c0_6 = arith.constant 0 : index
    %7 = vector.load %arg5[%c0_5, %c0_6] : memref<1x32xf32, #tpu.memory_space<vmem>>, vector<1x32xf32>
    %8 = vector.broadcast %7 : vector<1x32xf32> to vector<16x32xf32>
    %9 = arith.addf %6, %8 : vector<16x32xf32>
    %10 = vector.shape_cast %9 : vector<16x32xf32> to vector<2x8x32xf32>
    %c0_7 = arith.constant 0 : index
    %c0_8 = arith.constant 0 : index
    %c0_9 = arith.constant 0 : index
    %11 = vector.load %arg10[%c0_7, %c0_8, %c0_9] : memref<2x8x32xf32, #tpu.memory_space<vmem>>, vector<2x8x32xf32>
    tpu.vector_store %arg10[%c0_7, %c0_8, %c0_9], %10 {strides = array<i32>} : memref<2x8x32xf32, #tpu.memory_space<vmem>>, vector<2x8x32xf32>,
    %c0_10 = arith.constant 0 : index
    %c0_11 = arith.constant 0 : index
    %12 = vector.load %arg4[%c0_10, %c0_11] : memref<32x32xf32, #tpu.memory_space<vmem>>, vector<32x32xf32>
    %c0_12 = arith.constant 0 : index
    %c0_13 = arith.constant 0 : index
    %13 = vector.load %arg9[%c0_12, %c0_13] : memref<2x32xf32, #tpu.memory_space<vmem>>, vector<2x32xf32>
    %c0_i32_14 = arith.constant 0 : i32
    %c8_i32 = arith.constant 8 : i32
    %14 = arith.muli %c0_i32_14, %c8_i32 : i32
    %15 = tpu.assume_multiple %14, 8 : i32
    %c0_15 = arith.constant 0 : index
    %16 = arith.index_cast %15 : i32 to index
    %c0_16 = arith.constant 0 : index
    %17 = vector.load %arg10[%c0_15, %16, %c0_16] : memref<2x8x32xf32, #tpu.memory_space<vmem>>, vector<2x8x32xf32>
    %18 = vector.extract_strided_slice %17 {offsets = [0, 0, 0], sizes = [2, 1, 32], strides = [1, 1, 1]} : vector<2x8x32xf32> to vector<2x1x32xf32>
    %19 = vector.shape_cast %18 : vector<2x1x32xf32> to vector<2x32xf32>
    %cst_17 = arith.constant dense<0.000000e+00> : vector<2x32xf32>
    %20 = tpu.matmul %13, %12, %cst_17 {dimension_numbers = #tpu.dot_dimension_numbers<[1], [0], [0], [1], [0, 0, 1, 1], [], []>} : vector<2x32xf32>, vector<32x32xf32>, vector<2x32xf32> -> vector<2x32xf32>
    %21 = arith.addf %19, %20 : vector<2x32xf32>
    %cst_18 = arith.constant 0.000000e+00 : f32
    %22 = vector.broadcast %cst_18 : f32 to vector<2x32xf32>
    %23 = arith.maximumf %21, %22 : vector<2x32xf32>
    %24 = vector.extract_strided_slice %17 {offsets = [0, 1, 0], sizes = [2, 1, 32], strides = [1, 1, 1]} : vector<2x8x32xf32> to vector<2x1x32xf32>
    %25 = vector.shape_cast %24 : vector<2x1x32xf32> to vector<2x32xf32>
    %cst_19 = arith.constant dense<0.000000e+00> : vector<2x32xf32>
    %26 = tpu.matmul %23, %12, %cst_19 {dimension_numbers = #tpu.dot_dimension_numbers<[1], [0], [0], [1], [0, 0, 1, 1], [], []>} : vector<2x32xf32>, vector<32x32xf32>, vector<2x32xf32> -> vector<2x32xf32>
    %27 = arith.addf %25, %26 : vector<2x32xf32>
    %cst_20 = arith.constant 0.000000e+00 : f32
    %28 = vector.broadcast %cst_20 : f32 to vector<2x32xf32>
    %29 = arith.maximumf %27, %28 : vector<2x32xf32>
    %30 = vector.extract_strided_slice %17 {offsets = [0, 2, 0], sizes = [2, 1, 32], strides = [1, 1, 1]} : vector<2x8x32xf32> to vector<2x1x32xf32>
    %31 = vector.shape_cast %30 : vector<2x1x32xf32> to vector<2x32xf32>
    %cst_21 = arith.constant dense<0.000000e+00> : vector<2x32xf32>
    %32 = tpu.matmul %29, %12, %cst_21 {dimension_numbers = #tpu.dot_dimension_numbers<[1], [0], [0], [1], [0, 0, 1, 1], [], []>} : vector<2x32xf32>, vector<32x32xf32>, vector<2x32xf32> -> vector<2x32xf32>
    %33 = arith.addf %31, %32 : vector<2x32xf32>
    %cst_22 = arith.constant 0.000000e+00 : f32
    %34 = vector.broadcast %cst_22 : f32 to vector<2x32xf32>
    %35 = arith.maximumf %33, %34 : vector<2x32xf32>
    %36 = vector.extract_strided_slice %17 {offsets = [0, 3, 0], sizes = [2, 1, 32], strides = [1, 1, 1]} : vector<2x8x32xf32> to vector<2x1x32xf32>
    %37 = vector.shape_cast %36 : vector<2x1x32xf32> to vector<2x32xf32>
    %cst_23 = arith.constant dense<0.000000e+00> : vector<2x32xf32>
    %38 = tpu.matmul %35, %12, %cst_23 {dimension_numbers = #tpu.dot_dimension_numbers<[1], [0], [0], [1], [0, 0, 1, 1], [], []>} : vector<2x32xf32>, vector<32x32xf32>, vector<2x32xf32> -> vector<2x32xf32>
    %39 = arith.addf %37, %38 : vector<2x32xf32>
    %cst_24 = arith.constant 0.000000e+00 : f32
    %40 = vector.broadcast %cst_24 : f32 to vector<2x32xf32>
    %41 = arith.maximumf %39, %40 : vector<2x32xf32>
    %42 = vector.extract_strided_slice %17 {offsets = [0, 4, 0], sizes = [2, 1, 32], strides = [1, 1, 1]} : vector<2x8x32xf32> to vector<2x1x32xf32>
    %43 = vector.shape_cast %42 : vector<2x1x32xf32> to vector<2x32xf32>
    %cst_25 = arith.constant dense<0.000000e+00> : vector<2x32xf32>
    %44 = tpu.matmul %41, %12, %cst_25 {dimension_numbers = #tpu.dot_dimension_numbers<[1], [0], [0], [1], [0, 0, 1, 1], [], []>} : vector<2x32xf32>, vector<32x32xf32>, vector<2x32xf32> -> vector<2x32xf32>
    %45 = arith.addf %43, %44 : vector<2x32xf32>
    %cst_26 = arith.constant 0.000000e+00 : f32
    %46 = vector.broadcast %cst_26 : f32 to vector<2x32xf32>
    %47 = arith.maximumf %45, %46 : vector<2x32xf32>
    %48 = vector.extract_strided_slice %17 {offsets = [0, 5, 0], sizes = [2, 1, 32], strides = [1, 1, 1]} : vector<2x8x32xf32> to vector<2x1x32xf32>
    %49 = vector.shape_cast %48 : vector<2x1x32xf32> to vector<2x32xf32>
    %cst_27 = arith.constant dense<0.000000e+00> : vector<2x32xf32>
    %50 = tpu.matmul %47, %12, %cst_27 {dimension_numbers = #tpu.dot_dimension_numbers<[1], [0], [0], [1], [0, 0, 1, 1], [], []>} : vector<2x32xf32>, vector<32x32xf32>, vector<2x32xf32> -> vector<2x32xf32>
    %51 = arith.addf %49, %50 : vector<2x32xf32>
    %cst_28 = arith.constant 0.000000e+00 : f32
    %52 = vector.broadcast %cst_28 : f32 to vector<2x32xf32>
    %53 = arith.maximumf %51, %52 : vector<2x32xf32>
    %54 = vector.extract_strided_slice %17 {offsets = [0, 6, 0], sizes = [2, 1, 32], strides = [1, 1, 1]} : vector<2x8x32xf32> to vector<2x1x32xf32>
    %55 = vector.shape_cast %54 : vector<2x1x32xf32> to vector<2x32xf32>
    %cst_29 = arith.constant dense<0.000000e+00> : vector<2x32xf32>
    %56 = tpu.matmul %53, %12, %cst_29 {dimension_numbers = #tpu.dot_dimension_numbers<[1], [0], [0], [1], [0, 0, 1, 1], [], []>} : vector<2x32xf32>, vector<32x32xf32>, vector<2x32xf32> -> vector<2x32xf32>
    %57 = arith.addf %55, %56 : vector<2x32xf32>
    %cst_30 = arith.constant 0.000000e+00 : f32
    %58 = vector.broadcast %cst_30 : f32 to vector<2x32xf32>
    %59 = arith.maximumf %57, %58 : vector<2x32xf32>
    %60 = vector.extract_strided_slice %17 {offsets = [0, 7, 0], sizes = [2, 1, 32], strides = [1, 1, 1]} : vector<2x8x32xf32> to vector<2x1x32xf32>
    %61 = vector.shape_cast %60 : vector<2x1x32xf32> to vector<2x32xf32>
    %cst_31 = arith.constant dense<0.000000e+00> : vector<2x32xf32>
    %62 = tpu.matmul %59, %12, %cst_31 {dimension_numbers = #tpu.dot_dimension_numbers<[1], [0], [0], [1], [0, 0, 1, 1], [], []>} : vector<2x32xf32>, vector<32x32xf32>, vector<2x32xf32> -> vector<2x32xf32>
    %63 = arith.addf %61, %62 : vector<2x32xf32>
    %cst_32 = arith.constant 0.000000e+00 : f32
    %64 = vector.broadcast %cst_32 : f32 to vector<2x32xf32>
    %65 = arith.maximumf %63, %64 : vector<2x32xf32>
    %66 = vector.shape_cast %23 : vector<2x32xf32> to vector<2x1x32xf32>
    %67 = vector.shape_cast %29 : vector<2x32xf32> to vector<2x1x32xf32>
    %68 = vector.shape_cast %35 : vector<2x32xf32> to vector<2x1x32xf32>
    %69 = vector.shape_cast %41 : vector<2x32xf32> to vector<2x1x32xf32>
    %70 = vector.shape_cast %47 : vector<2x32xf32> to vector<2x1x32xf32>
    %71 = vector.shape_cast %53 : vector<2x32xf32> to vector<2x1x32xf32>
    %72 = vector.shape_cast %59 : vector<2x32xf32> to vector<2x1x32xf32>
    %73 = vector.shape_cast %65 : vector<2x32xf32> to vector<2x1x32xf32>
    %74 = tpu.concatenate %66, %67, %68, %69, %70, %71, %72, %73 in 1 : vector<2x1x32xf32>, vector<2x1x32xf32>, vector<2x1x32xf32>, vector<2x1x32xf32>, vector<2x1x32xf32>, vector<2x1x32xf32>, vector<2x1x32xf32>, vector<2x1x32xf32> -> vector<2x8x32xf32>
    %c0_33 = arith.constant 0 : index
    %75 = arith.index_cast %15 : i32 to index
    %c0_34 = arith.constant 0 : index
    %76 = vector.load %arg10[%c0_33, %75, %c0_34] : memref<2x8x32xf32, #tpu.memory_space<vmem>>, vector<2x8x32xf32>
    tpu.vector_store %arg10[%c0_33, %75, %c0_34], %74 {strides = array<i32>} : memref<2x8x32xf32, #tpu.memory_space<vmem>>, vector<2x8x32xf32>,
    %c1_i32 = arith.constant 1 : i32
    %c0_35 = arith.constant 0 : index
    %c0_36 = arith.constant 0 : index
    %77 = vector.load %arg9[%c0_35, %c0_36] : memref<2x32xf32, #tpu.memory_space<vmem>>, vector<2x32xf32>
    tpu.vector_store %arg9[%c0_35, %c0_36], %65 {strides = array<i32>} : memref<2x32xf32, #tpu.memory_space<vmem>>, vector<2x32xf32>,
    %c0_37 = arith.constant 0 : index
    %c0_38 = arith.constant 0 : index
    %c0_39 = arith.constant 0 : index
    %78 = vector.load %arg10[%c0_37, %c0_38, %c0_39] : memref<2x8x32xf32, #tpu.memory_space<vmem>>, vector<2x8x32xf32>
    %79 = vector.shape_cast %78 : vector<2x8x32xf32> to vector<16x32xf32>
    %c0_40 = arith.constant 0 : index
    %c0_41 = arith.constant 0 : index
    %80 = vector.load %arg6[%c0_40, %c0_41] : memref<32x8xf32, #tpu.memory_space<vmem>>, vector<32x8xf32>
    %cst_42 = arith.constant dense<0.000000e+00> : vector<16x8xf32>
    %81 = tpu.matmul %79, %80, %cst_42 {dimension_numbers = #tpu.dot_dimension_numbers<[1], [0], [0], [1], [0, 0, 1, 1], [], []>} : vector<16x32xf32>, vector<32x8xf32>, vector<16x8xf32> -> vector<16x8xf32>
    %c0_43 = arith.constant 0 : index
    %c0_44 = arith.constant 0 : index
    %82 = vector.load %arg7[%c0_43, %c0_44] : memref<1x8xf32, #tpu.memory_space<vmem>>, vector<1x8xf32>
    %83 = vector.broadcast %82 : vector<1x8xf32> to vector<16x8xf32>
    %84 = arith.addf %81, %83 : vector<16x8xf32>
    %85 = vector.shape_cast %84 : vector<16x8xf32> to vector<2x8x8xf32>
    %c0_45 = arith.constant 0 : index
    %c0_46 = arith.constant 0 : index
    %c0_47 = arith.constant 0 : index
    %86 = vector.load %arg8[%c0_45, %c0_46, %c0_47] : memref<2x8x8xf32, #tpu.memory_space<vmem>>, vector<2x8x8xf32>
    tpu.vector_store %arg8[%c0_45, %c0_46, %c0_47], %85 {strides = array<i32>} : memref<2x8x8xf32, #tpu.memory_space<vmem>>, vector<2x8x8xf32>,
    return
  }
  func.func @transform_0(%arg0: i32, %arg1: i32) -> (i32, i32, i32) {
    %c0_i32 = arith.constant 0 : i32
    %c0_i32_0 = arith.constant 0 : i32
    return %arg0, %arg1, %c0_i32 : i32, i32, i32
  }
  func.func @transform_1(%arg0: i32, %arg1: i32) -> (i32, i32) {
    %c0_i32 = arith.constant 0 : i32
    %c0_i32_0 = arith.constant 0 : i32
    %c0_i32_1 = arith.constant 0 : i32
    return %c0_i32, %c0_i32_0 : i32, i32
  }
  func.func @transform_2(%arg0: i32, %arg1: i32) -> (i32, i32) {
    %c0_i32 = arith.constant 0 : i32
    %c0_i32_0 = arith.constant 0 : i32
    %c0_i32_1 = arith.constant 0 : i32
    return %c0_i32, %c0_i32_0 : i32, i32
  }
  func.func @transform_3(%arg0: i32, %arg1: i32) -> (i32, i32) {
    %c0_i32 = arith.constant 0 : i32
    %c0_i32_0 = arith.constant 0 : i32
    %c0_i32_1 = arith.constant 0 : i32
    return %c0_i32, %c0_i32_0 : i32, i32
  }
  func.func @transform_4(%arg0: i32, %arg1: i32) -> (i32, i32) {
    %c0_i32 = arith.constant 0 : i32
    %c0_i32_0 = arith.constant 0 : i32
    %c0_i32_1 = arith.constant 0 : i32
    return %c0_i32, %c0_i32_0 : i32, i32
  }
  func.func @transform_5(%arg0: i32, %arg1: i32) -> (i32, i32) {
    %c0_i32 = arith.constant 0 : i32
    %c0_i32_0 = arith.constant 0 : i32
    %c0_i32_1 = arith.constant 0 : i32
    return %c0_i32, %c0_i32_0 : i32, i32
  }
  func.func @transform_6(%arg0: i32, %arg1: i32) -> (i32, i32, i32) {
    %c0_i32 = arith.constant 0 : i32
    %c0_i32_0 = arith.constant 0 : i32
    return %arg0, %arg1, %c0_i32 : i32, i32, i32
  }
}

</mosaic_0001>

<bundles_post_ra>
// kernel: tpu_custom_call.1
= control target key start
LH: loop header
LB: loop body
LE: loop exit
PB: predicated region body
PF: predicated region fallthrough
CT: control target
= control target key end

     0   :  { %11 = vsyncpa [#allocation5], 0  ;;  %s1513_s0 = inlined_call_operand.hbm [shape: f32[2,8,16], index: 0, kind: input, shape index: {}]   ;;  %s1514_s1 = inlined_call_operand.hbm [shape: f32[16,32], index: 1, kind: input, shape index: {}]   ;;  %s1515_s2 = inlined_call_operand.vmem [shape: f32[32,32], index: 2, kind: input, shape index: {}]   ;;  %s1516_s3 = inlined_call_operand.vmem [shape: f32[1,32], index: 3, kind: input, shape index: {}]   ;;  %s1517_s4 = inlined_call_operand.vmem [shape: f32[32,8], index: 4, kind: input, shape index: {}]   ;;  %s1518_s5 = inlined_call_operand.vmem [shape: f32[1,8], index: 5, kind: input, shape index: {}]   ;;  %s1519_s6 = inlined_call_operand.hbm [shape: f32[2,8,8], index: 6, kind: output, shape index: {}]  }
   0x1   :  { %12 = vsyncpa [#allocation8], 0 }
   0x2   :  { %13 = vsyncpa [#allocation6], 0  ;;  %s1299_s21 = smov [#allocation4]   ;;  %s1227_s25 = scalar_lea.hbm %s1513_s0, 256 }
   0x3   :  { %s19_s22 = sshll.u32 %s1299_s21, 4  ;;  %p1228_p0 = scmp.ne.s32.totalorder %s1513_s0, %s1227_s25  ;;  %s20_s22 = int_to_ptr.vmem [resolvable:$true] %s19_s22 }
   0x4   :  { %p1231_p1 = scmp.lt.u32.totalorder %s1227_s25, %s1513_s0 }
   0x6   :  { %p1233_p2 = pnand %p1231_p1, %p1228_p0 }
   0x8   :  { %1236 = shalt.err (!%p1233_p2)
}
   0x9   :  { %s1237_s30 = scalar_lea.vmem %s20_s22, 256  ;;  %p1242_p4 = scmp.lt.s32.totalorder %s20_s22, %s20_s22 }
   0xa   :  { %p1238_p3 = scmp.ne.s32.totalorder %s20_s22, %s1237_s30  ;;  %p1243_p5 = scmp.lt.s32.totalorder %s1237_s30, %s1237_s30 }
   0xc   :  { %p1244_p6 = por %p1243_p5, %p1242_p4 }
   0xe   :  { %p1245_p7 = pnand %p1244_p6, %p1238_p3 }
  0x10   :  { %1248 = shalt.err (!%p1245_p7)
}
  0x11   :  { %s1300_s7 = smov 128   ;;  %s1301_s8 = smov 8  }
  0x12   :  { %25 = dma.hbm_to_vmem [thread:$0]  %s1513_s0, 256, %s20_s22, [#allocation5], %s1300_s7, %s1300_s7, %s1301_s8  }
  0x13   :  { %s1302_s11 = smov [#allocation7]   ;;  %s1249_s15 = scalar_lea.hbm %s1514_s1, 256 }
  0x14   :  { %s31_s12 = sshll.u32 %s1302_s11, 4  ;;  %p1250_p8 = scmp.ne.s32.totalorder %s1514_s1, %s1249_s15  ;;  %s32_s12 = int_to_ptr.vmem [resolvable:$true] %s31_s12 }
  0x15   :  { %p1253_p9 = scmp.lt.u32.totalorder %s1249_s15, %s1514_s1 }
  0x17   :  { %p1255_p10 = pnand %p1253_p9, %p1250_p8 }
  0x19   :  { %1258 = shalt.err (!%p1255_p10)
}
  0x1a   :  { %s1259_s20 = scalar_lea.vmem %s32_s12, 256  ;;  %p1264_p12 = scmp.lt.s32.totalorder %s32_s12, %s32_s12 }
  0x1b   :  { %p1260_p11 = scmp.ne.s32.totalorder %s32_s12, %s1259_s20  ;;  %p1265_p13 = scmp.lt.s32.totalorder %s1259_s20, %s1259_s20 }
  0x1d   :  { %p1266_p0 = por %p1265_p13, %p1264_p12 }
  0x1f   :  { %p1267_p1 = pnand %p1266_p0, %p1260_p11 }
  0x21   :  { %1270 = shalt.err (!%p1267_p1)
}
  0x22   :  { %37 = dma.hbm_to_vmem [thread:$0]  %s1514_s1, 256, %s32_s12, [#allocation8], %s1300_s7, %s1300_s7, %s1301_s8  }
  0x23   :  { %1293 = dma.done.wait [#allocation5], 256  }
  0x24   :  { %1294 = vsyncadd [#allocation5], 4294967040 }
  0x25   :  { %1295 = dma.done.wait [#allocation8], 256  }
  0x26   :  { %1296 = vsyncadd [#allocation8], 4294967040  ;;  %v1303_v0 = vmov 0.0|0.0   ;;  %vm1304_vm0 = vmmov 0   ;;  %v1305_v1 = vmov 0.0   ;;  %vm56_vm1 = vcmask 254976  }
  0x27   :  { %1163 = vmatprep.subr.bf16.mxu1 %v1303_v0  ;;  %1068 = vmatprep.mubr.msk.f32.mxu1 %vm1304_vm0, %v1305_v1  ;;  %57 = vst.msk [vmem:[#allocation2] sm:$0x3] %vm56_vm1, %v1305_v1  ;;  %vm69_vm2 = vcmask 130048   ;;  %v60_v2 = vld [vmem:[#allocation7] sm:$0xff]  ;;  %v61_v3 = vld [vmem:[#allocation7 + $0x8] sm:$0xff]  ;;  %v58_v4 = vld [vmem:[#allocation4] sm:$0xff] }
  0x28   :  { %v1159_v5 = vpack.c.bf16 %v61_v3, %v60_v2  ;;  %1057 = vmatprep.mubr.msk.f32.mxu0 %vm69_vm2, %v58_v4  ;;  %v154_v6 = vld [vmem:[%s1515_s2] sm:$0xff]  ;;  %v155_v7 = vld [vmem:[%s1515_s2 + $0x8] sm:$0xff]  ;;  %v156_v9 = vld [vmem:[%s1515_s2 + $0x10] sm:$0xff]  ;;  %vm151_vm3 = vcmask 261120   ;;  %vm245_vm4 = vcmask 1041409   ;;  %vm842_vm5 = vcmask 1040384  }
  0x29   :  { %v1383_v8 = vpack.c.bf16 %v155_v7, %v154_v6  ;;  %v157_v10 = vld [vmem:[%s1515_s2 + $0x18] sm:$0xff]  ;;  %v989_v14 = vld [vmem:[%s1516_s3] ss:$0 sm:$0xff]  ;;  %vm845_vm6 = vcmask 1041408   ;;  %vm848_vm7 = vcmask 1042432   ;;  %vm851_vm8 = vcmask 1043456  }
  0x2a   :  { %1160 = vmatprep.subr.bf16.mxu0 %v1159_v5  ;;  %v59_v11 = vld [vmem:[#allocation4 + $0x8] sm:$0xff]  ;;  %v1392_v12 = vpack.c.bf16 %v157_v10, %v156_v9  ;;  %vm854_vm9 = vcmask 1044480   ;;  %vm857_vm10 = vcmask 1045504   ;;  %vm860_vm11 = vcmask 1046528   ;;  %s1306_s16 = smov [#allocation9]  }
  0x2b   :  { %1162 = vmatpush3.bf16.msra.mxu0 %v1159_v5  ;;  %1165 = vmatpush3.bf16.msra.mxu1 %v1383_v8  ;;  %vm870_vm12 = vcmask 261127   ;;  %vm872_vm13 = vcmask 253952   ;;  %s976_s17 = sshll.u32 %s1306_s16, 4  ;;  %vm968_vm14 = vcmask 64512   ;;  %s977_s17 = int_to_ptr.vmem [resolvable:$true] %s976_s17 }
  0x2c   :  { %1166 = vmatprep.subr.bf16.mxu1 %v1303_v0  ;;  %1169 = vmatprep.subr.bf16.mxu0 %v1303_v0  ;;  %s1271_s18 = scalar_lea.vmem %s977_s17, 256  ;;  %p1276_p3 = scmp.lt.s32.totalorder %s977_s17, %s977_s17 }
  0x2d   :  { %p1272_p2 = scmp.ne.s32.totalorder %s977_s17, %s1271_s18  ;;  %p1277_p4 = scmp.lt.s32.totalorder %s1271_s18, %s1271_s18 }
  0x2e   :  { %1058 = vmatmul.mubr.msk.f32.vlgmr.msra.gmra.mrb[0].mxu0 %vm69_vm2, %v59_v11  ;;  %v158_v13 = vld [vmem:[#allocation2] sm:$0x3] }
  0x2f   :  { %1168 = vmatpush3.bf16.msra.mxu1 %v1392_v12  ;;  %1171 = vmatpush3.bf16.msra.mxu0 %v1383_v8  ;;  %p1278_p5 = por %p1277_p4, %p1276_p3 }
  0x30   :  { %1172 = vmatprep.subr.bf16.mxu0 %v1303_v0  ;;  %1079 = vmatprep.mubr.msk.f32.mxu0 %vm1304_vm0, %v1305_v1 }
  0x31   :  { %1175 = vmatprep.subr.bf16.mxu1 %v1303_v0  ;;  %p1279_p6 = pnand %p1278_p5, %p1272_p2 }
  0x32   :  { %1069 = vmatmul.mubr.msk.f32.vlgmr.msra.gmra.mrb[0].mxu1 %vm151_vm3, %v158_v13 }
  0x33   :  { %1174 = vmatpush3.bf16.msra.mxu0 %v1392_v12  ;;  %1177 = vmatpush3.bf16.msra.mxu1 %v1383_v8 }
  0x34   :  { %1178 = vmatprep.subr.bf16.mxu1 %v1303_v0  ;;  %1090 = vmatprep.mubr.msk.f32.mxu1 %vm1304_vm0, %v1305_v1 }
  0x35   :  { %1181 = vmatprep.subr.bf16.mxu0 %v1303_v0 }
  0x37   :  { %1180 = vmatpush3.bf16.msra.mxu1 %v1392_v12 }
  0x38   :  { %1187 = vmatprep.subr.bf16.mxu1 %v1303_v0 }
 0x101   :  { %v1059_v15 = vpop.f32.mrb[0].mxu0 }
 0x102   :  { %v148_v16 = vadd.f32 %v1059_v15, %v989_v14  ;;  %v142_v17 = vpop.f32.mrb[1].mxu0 }
 0x103   :  { %v143_v18 = vadd.f32 %v989_v14, %v142_v17 }
 0x104   :  { %153 = vst.msk [vmem:[#allocation3 + $0x8] sm:$0xff] %vm151_vm3, %v148_v16 }
 0x105   :  { %152 = vst.msk [vmem:[#allocation3] sm:$0xff] %vm151_vm3, %v143_v18  ;;  %v230_v19 = vpop.f32.mrb[0].mxu1 }
 0x106   :  { %v1070_v20 = vpop.f32.mrb[1].mxu1  ;;  %v235_v21 = vrot.slane %v230_v19, 1 }
 0x10b   :  { %v1417_v22 = vld [vmem:[#allocation3 + $0x8] sm:$0xff] }
 0x10c   :  { %v1419_v23 = vld [vmem:[#allocation3] sm:$0xff]  ;;  %v239_v24 = vadd.f32 %v235_v21, %v1417_v22 }
 0x10d   :  { %v238_v25 = vadd.f32 %v230_v19, %v1419_v23 }
 0x10e   :  { %v241_v26 = vmax.f32 %v239_v24, 0.0 }
 0x10f   :  { %v240_v27 = vmax.f32 %v238_v25, 0.0 }
 0x110   :  { %v244_v28 = vrot.slane %v241_v26, 7 }
 0x112   :  { %v246_v29 = vsel %vm245_vm4, %v244_v28, %v240_v27 }
 0x113   :  { %1080 = vmatmul.mubr.msk.f32.vlgmr.msra.gmra.mrb[2].mxu0 %vm151_vm3, %v246_v29 }
 0x114   :  { %1183 = vmatpush3.bf16.msra.mxu0 %v1383_v8  ;;  %1101 = vmatprep.mubr.msk.f32.mxu0 %vm1304_vm0, %v1305_v1 }
 0x115   :  { %1184 = vmatprep.subr.bf16.mxu0 %v1303_v0 }
 0x118   :  { %1186 = vmatpush3.bf16.msra.mxu0 %v1392_v12 }
 0x119   :  { %1193 = vmatprep.subr.bf16.mxu0 %v1303_v0 }
 0x1e6   :  { %v315_v30 = vpop.f32.mrb[2].mxu0 }
 0x1e7   :  { %v320_v31 = vrot.slane %v315_v30, 7  ;;  %v1081_v32 = vpop.f32.mrb[3].mxu0  ;;  %v324_v34 = vadd.f32 %v315_v30, %v1417_v22 }
 0x1e9   :  { %v323_v33 = vadd.f32 %v320_v31, %v1419_v23  ;;  %v326_v36 = vmax.f32 %v324_v34, 0.0 }
 0x1eb   :  { %v325_v35 = vmax.f32 %v323_v33, 0.0  ;;  %v844_v48 = vsel %vm842_vm5, %v241_v26, %v326_v36 }
 0x1ed   :  { %v329_v37 = vrot.slane %v325_v35, 1  ;;  %v843_v47 = vsel %vm842_vm5, %v240_v27, %v325_v35 }
 0x1ef   :  { %v330_v38 = vsel %vm245_vm4, %v326_v36, %v329_v37 }
 0x1f0   :  { %1091 = vmatmul.mubr.msk.f32.vlgmr.msra.gmra.mrb[2].mxu1 %vm151_vm3, %v330_v38 }
 0x1f1   :  { %1189 = vmatpush3.bf16.msra.mxu1 %v1383_v8  ;;  %1112 = vmatprep.mubr.msk.f32.mxu1 %vm1304_vm0, %v1305_v1 }
 0x1f2   :  { %1190 = vmatprep.subr.bf16.mxu1 %v1303_v0 }
 0x1f5   :  { %1192 = vmatpush3.bf16.msra.mxu1 %v1392_v12 }
 0x1f6   :  { %1199 = vmatprep.subr.bf16.mxu1 %v1303_v0 }
 0x2c3   :  { %v399_v39 = vpop.f32.mrb[2].mxu1 }
 0x2c4   :  { %v404_v40 = vrot.slane %v399_v39, 6  ;;  %v405_v41 = vrot.slane %v399_v39, 7  ;;  %v1092_v42 = vpop.f32.mrb[3].mxu1 }
 0x2c6   :  { %v408_v43 = vadd.f32 %v404_v40, %v1419_v23  ;;  %v409_v44 = vadd.f32 %v405_v41, %v1417_v22 }
 0x2c8   :  { %v410_v45 = vmax.f32 %v408_v43, 0.0  ;;  %v411_v46 = vmax.f32 %v409_v44, 0.0  ;;  %v876_v44 = vld [vmem:[%s1517_s4] sm:$0xff] }
 0x2ca   :  { %v414_v49 = vrot.slane %v410_v45, 2  ;;  %v415_v50 = vrot.slane %v411_v46, 1  ;;  %v846_v51 = vsel %vm845_vm6, %v843_v47, %v410_v45  ;;  %v847_v52 = vsel %vm845_vm6, %v844_v48, %v411_v46  ;;  %v877_v45 = vld [vmem:[%s1517_s4 + $0x8] sm:$0xff]  ;;  %v878_v47 = vld [vmem:[%s1517_s4 + $0x10] sm:$0xff]  ;;  %v879_v48 = vld [vmem:[%s1517_s4 + $0x18] sm:$0xff] }
 0x2cb   :  { %v1211_v46 = vpack.c.bf16 %v877_v45, %v876_v44 }
 0x2cc   :  { %v416_v53 = vsel %vm245_vm4, %v415_v50, %v414_v49  ;;  %v1215_v49 = vpack.c.bf16 %v879_v48, %v878_v47 }
 0x2cd   :  { %1102 = vmatmul.mubr.msk.f32.vlgmr.msra.gmra.mrb[4].mxu0 %vm151_vm3, %v416_v53 }
 0x2ce   :  { %1195 = vmatpush3.bf16.msra.mxu0 %v1383_v8  ;;  %1123 = vmatprep.mubr.msk.f32.mxu0 %vm1304_vm0, %v1305_v1 }
 0x2cf   :  { %1196 = vmatprep.subr.bf16.mxu0 %v1303_v0 }
 0x2d2   :  { %1198 = vmatpush3.bf16.msra.mxu0 %v1392_v12 }
 0x2d3   :  { %1205 = vmatprep.subr.bf16.mxu0 %v1303_v0 }
 0x3a0   :  { %v485_v54 = vpop.f32.mrb[4].mxu0 }
 0x3a1   :  { %v490_v55 = vrot.slane %v485_v54, 5  ;;  %v491_v56 = vrot.slane %v485_v54, 6  ;;  %v1103_v57 = vpop.f32.mrb[5].mxu0 }
 0x3a3   :  { %v494_v58 = vadd.f32 %v490_v55, %v1419_v23  ;;  %v495_v59 = vadd.f32 %v491_v56, %v1417_v22 }
 0x3a5   :  { %v496_v60 = vmax.f32 %v494_v58, 0.0  ;;  %v497_v61 = vmax.f32 %v495_v59, 0.0 }
 0x3a7   :  { %v500_v62 = vrot.slane %v496_v60, 3  ;;  %v501_v63 = vrot.slane %v497_v61, 2  ;;  %v849_v2 = vsel %vm848_vm7, %v846_v51, %v496_v60  ;;  %v850_v3 = vsel %vm848_vm7, %v847_v52, %v497_v61 }
 0x3a9   :  { %v502_v4 = vsel %vm245_vm4, %v501_v63, %v500_v62 }
 0x3aa   :  { %1113 = vmatmul.mubr.msk.f32.vlgmr.msra.gmra.mrb[4].mxu1 %vm151_vm3, %v502_v4 }
 0x3ab   :  { %1201 = vmatpush3.bf16.msra.mxu1 %v1383_v8  ;;  %1134 = vmatprep.mubr.msk.f32.mxu1 %vm1304_vm0, %v1305_v1 }
 0x3ac   :  { %1202 = vmatprep.subr.bf16.mxu1 %v1303_v0 }
 0x3af   :  { %1204 = vmatpush3.bf16.msra.mxu1 %v1392_v12 }
 0x3b0   :  { %1212 = vmatprep.subr.bf16.mxu1 %v1211_v46 }
 0x47d   :  { %v571_v5 = vpop.f32.mrb[4].mxu1 }
 0x47e   :  { %v576_v6 = vrot.slane %v571_v5, 4  ;;  %v577_v7 = vrot.slane %v571_v5, 5  ;;  %v1114_v9 = vpop.f32.mrb[5].mxu1 }
 0x480   :  { %v580_v10 = vadd.f32 %v576_v6, %v1419_v23  ;;  %v581_v11 = vadd.f32 %v577_v7, %v1417_v22 }
 0x482   :  { %v582_v13 = vmax.f32 %v580_v10, 0.0  ;;  %v583_v14 = vmax.f32 %v581_v11, 0.0 }
 0x484   :  { %v586_v15 = vrot.slane %v582_v13, 4  ;;  %v587_v16 = vrot.slane %v583_v14, 3  ;;  %v852_v17 = vsel %vm851_vm8, %v849_v2, %v582_v13  ;;  %v853_v18 = vsel %vm851_vm8, %v850_v3, %v583_v14 }
 0x486   :  { %v588_v19 = vsel %vm245_vm4, %v587_v16, %v586_v15 }
 0x487   :  { %1124 = vmatmul.mubr.msk.f32.vlgmr.msra.gmra.mrb[6].mxu0 %vm151_vm3, %v588_v19 }
 0x488   :  { %1207 = vmatpush3.bf16.msra.mxu0 %v1383_v8  ;;  %1145 = vmatprep.mubr.msk.f32.mxu0 %vm1304_vm0, %v1305_v1 }
 0x489   :  { %1208 = vmatprep.subr.bf16.mxu0 %v1303_v0 }
 0x48c   :  { %1210 = vmatpush3.bf16.msra.mxu0 %v1392_v12 }
 0x55a   :  { %v657_v20 = vpop.f32.mrb[6].mxu0 }
 0x55b   :  { %v662_v21 = vrot.slane %v657_v20, 3  ;;  %v663_v24 = vrot.slane %v657_v20, 4  ;;  %v1125_v25 = vpop.f32.mrb[7].mxu0 }
 0x55d   :  { %v666_v26 = vadd.f32 %v662_v21, %v1419_v23  ;;  %v667_v27 = vadd.f32 %v663_v24, %v1417_v22 }
 0x55f   :  { %v668_v28 = vmax.f32 %v666_v26, 0.0  ;;  %v669_v29 = vmax.f32 %v667_v27, 0.0 }
 0x561   :  { %v672_v30 = vrot.slane %v668_v28, 5  ;;  %v673_v8 = vrot.slane %v669_v29, 4  ;;  %v855_v31 = vsel %vm854_vm9, %v852_v17, %v668_v28  ;;  %v856_v32 = vsel %vm854_vm9, %v853_v18, %v669_v29 }
 0x563   :  { %v674_v1 = vsel %vm245_vm4, %v673_v8, %v672_v30 }
 0x564   :  { %1135 = vmatmul.mubr.msk.f32.vlgmr.msra.gmra.mrb[6].mxu1 %vm151_vm3, %v674_v1 }
 0x565   :  { %1214 = vmatpush3.bf16.msra.mxu1 %v1211_v46 }
 0x566   :  { %1216 = vmatprep.subr.bf16.mxu1 %v1215_v49 }
 0x569   :  { %1218 = vmatpush3.bf16.msra.mxu1 %v1215_v49 }
 0x637   :  { %v743_v0 = vpop.f32.mrb[6].mxu1 }
 0x638   :  { %v748_v12 = vrot.slane %v743_v0, 2  ;;  %v749_v33 = vrot.slane %v743_v0, 3  ;;  %v1136_v34 = vpop.f32.mrb[7].mxu1 }
 0x63a   :  { %v752_v35 = vadd.f32 %v748_v12, %v1419_v23  ;;  %v753_v36 = vadd.f32 %v749_v33, %v1417_v22 }
 0x63c   :  { %v754_v37 = vmax.f32 %v752_v35, 0.0  ;;  %v755_v38 = vmax.f32 %v753_v36, 0.0 }
 0x63e   :  { %v758_v39 = vrot.slane %v754_v37, 6  ;;  %v759_v40 = vrot.slane %v755_v38, 5  ;;  %v858_v41 = vsel %vm857_vm10, %v855_v31, %v754_v37  ;;  %v859_v42 = vsel %vm857_vm10, %v856_v32, %v755_v38 }
 0x640   :  { %v760_v43 = vsel %vm245_vm4, %v759_v40, %v758_v39 }
 0x641   :  { %1146 = vmatmul.mubr.msk.f32.vlgmr.msra.gmra.mrb[8].mxu0 %vm151_vm3, %v760_v43 }
 0x714   :  { %v829_v50 = vpop.f32.mrb[8].mxu0 }
 0x715   :  { %v834_v51 = vrot.slane %v829_v50, 1  ;;  %v835_v52 = vrot.slane %v829_v50, 2  ;;  %v1147_v53 = vpop.f32.mrb[9].mxu0 }
 0x717   :  { %v838_v54 = vadd.f32 %v834_v51, %v1419_v23  ;;  %v839_v55 = vadd.f32 %v835_v52, %v1417_v22  ;;  %v1000_v22 = vld [vmem:[%s1518_s5] ss:$0 sm:$0xff] }
 0x719   :  { %v840_v56 = vmax.f32 %v838_v54, 0.0  ;;  %v841_v57 = vmax.f32 %v839_v55, 0.0 }
 0x71b   :  { %v861_v58 = vsel %vm860_vm11, %v858_v41, %v840_v56  ;;  %v862_v59 = vsel %vm860_vm11, %v859_v42, %v841_v57  ;;  %v867_v60 = vrot.slane %v841_v57, 7  ;;  %871 = vst.msk [vmem:[#allocation2 - $0x7] sm:$0x80] %vm870_vm12, %v840_v56 }
 0x71c   :  { %863 = vst.msk [vmem:[#allocation3] sm:$0xff] %vm151_vm3, %v861_v58  ;;  %864 = vst.msk [vmem:[#allocation3 + $0x8] sm:$0xff] %vm151_vm3, %v862_v59 }
 0x71d   :  { %873 = vst.msk [vmem:[#allocation2 + $0x1] sm:$0x1] %vm872_vm13, %v867_v60 }
 0x723   :  { %v874_v61 = vld [vmem:[#allocation3] sm:$0xff]  ;;  %v875_v62 = vld [vmem:[#allocation3 + $0x8] sm:$0xff] }
 0x724   :  { %1156 = vmatprep.mubr.msk.f32.mxu1 %vm151_vm3, %v874_v61 }
 0x725   :  { %1157 = vmatmul.mubr.msk.f32.vlgmr.msra.gmra.mrb[8].mxu1 %vm151_vm3, %v875_v62 }
 0x7f8   :  { %v1158_v23 = vpop.f32.mrb[8].mxu1 }
 0x7f9   :  { %v965_v63 = vadd.f32 %v1158_v23, %v1000_v22  ;;  %v959_v2 = vpop.f32.mrb[9].mxu1 }
 0x7fa   :  { %v960_v3 = vadd.f32 %v1000_v22, %v959_v2 }
 0x7fb   :  { %970 = vst.msk [vmem:[#allocation9 + $0x8] sm:$0xff] %vm968_vm14, %v965_v63 }
 0x7fc   :  { %969 = vst.msk [vmem:[#allocation9] sm:$0xff] %vm968_vm14, %v960_v3 }
 0x7fd   :  { %1282 = shalt.err (!%p1279_p6)
}
 0x7fe   :  { %s1283_s5 = scalar_lea.hbm %s1519_s6, 256 }
 0x7ff   :  { %p1284_p7 = scmp.ne.s32.totalorder %s1519_s6, %s1283_s5  ;;  %p1287_p8 = scmp.lt.u32.totalorder %s1283_s5, %s1519_s6 }
 0x801   :  { %p1289_p9 = pnand %p1287_p8, %p1284_p7 }
 0x803   :  { %1292 = shalt.err (!%p1289_p9)
}
 0x804   :  { %982 = dma.vmem_to_hbm [thread:$0]  %s977_s17, 256, %s1519_s6, [#allocation6], %s1300_s7, %s1300_s7, %s1301_s8  }
 0x805   :  { %1297 = dma.done.wait [#allocation6], 256  }
 0x806   :  { %1298 = vsyncadd [#allocation6], 4294967040 }
 0x807   :  { %986 = vsyncpa [#allocation5], 1 }
 0x808   :  { %987 = vsyncpa [#allocation8], 1 }
 0x809   :  { %988 = vsyncpa [#allocation6], 1 }

// kernel: tpu_custom_call.1
= control target key start
LH: loop header
LB: loop body
LE: loop exit
PB: predicated region body
PF: predicated region fallthrough
CT: control target
= control target key end

     0   :  { %11 = vsyncpa [#allocation5], 0  ;;  %s1513_s0 = inlined_call_operand.hbm [shape: f32[2,8,16], index: 0, kind: input, shape index: {}]   ;;  %s1514_s1 = inlined_call_operand.hbm [shape: f32[16,32], index: 1, kind: input, shape index: {}]   ;;  %s1515_s2 = inlined_call_operand.vmem [shape: f32[32,32], index: 2, kind: input, shape index: {}]   ;;  %s1516_s3 = inlined_call_operand.vmem [shape: f32[1,32], index: 3, kind: input, shape index: {}]   ;;  %s1517_s4 = inlined_call_operand.vmem [shape: f32[32,8], index: 4, kind: input, shape index: {}]   ;;  %s1518_s5 = inlined_call_operand.vmem [shape: f32[1,8], index: 5, kind: input, shape index: {}]   ;;  %s1519_s6 = inlined_call_operand.hbm [shape: f32[2,8,8], index: 6, kind: output, shape index: {}]  }
   0x1   :  { %12 = vsyncpa [#allocation8], 0 }
   0x2   :  { %13 = vsyncpa [#allocation6], 0  ;;  %s1299_s21 = smov [#allocation4]   ;;  %s1227_s25 = scalar_lea.hbm %s1513_s0, 256 }
   0x3   :  { %s19_s22 = sshll.u32 %s1299_s21, 4  ;;  %p1228_p0 = scmp.ne.s32.totalorder %s1513_s0, %s1227_s25  ;;  %s20_s22 = int_to_ptr.vmem [resolvable:$true] %s19_s22 }
   0x4   :  { %p1231_p1 = scmp.lt.u32.totalorder %s1227_s25, %s1513_s0 }
   0x6   :  { %p1233_p2 = pnand %p1231_p1, %p1228_p0 }
   0x8   :  { %1236 = shalt.err (!%p1233_p2)
}
   0x9   :  { %s1237_s30 = scalar_lea.vmem %s20_s22, 256  ;;  %p1242_p4 = scmp.lt.s32.totalorder %s20_s22, %s20_s22 }
   0xa   :  { %p1238_p3 = scmp.ne.s32.totalorder %s20_s22, %s1237_s30  ;;  %p1243_p5 = scmp.lt.s32.totalorder %s1237_s30, %s1237_s30 }
   0xc   :  { %p1244_p6 = por %p1243_p5, %p1242_p4 }
   0xe   :  { %p1245_p7 = pnand %p1244_p6, %p1238_p3 }
  0x10   :  { %1248 = shalt.err (!%p1245_p7)
}
  0x11   :  { %s1300_s7 = smov 128   ;;  %s1301_s8 = smov 8  }
  0x12   :  { %25 = dma.hbm_to_vmem [thread:$0]  %s1513_s0, 256, %s20_s22, [#allocation5], %s1300_s7, %s1300_s7, %s1301_s8  }
  0x13   :  { %s1302_s11 = smov [#allocation7]   ;;  %s1249_s15 = scalar_lea.hbm %s1514_s1, 256 }
  0x14   :  { %s31_s12 = sshll.u32 %s1302_s11, 4  ;;  %p1250_p8 = scmp.ne.s32.totalorder %s1514_s1, %s1249_s15  ;;  %s32_s12 = int_to_ptr.vmem [resolvable:$true] %s31_s12 }
  0x15   :  { %p1253_p9 = scmp.lt.u32.totalorder %s1249_s15, %s1514_s1 }
  0x17   :  { %p1255_p10 = pnand %p1253_p9, %p1250_p8 }
  0x19   :  { %1258 = shalt.err (!%p1255_p10)
}
  0x1a   :  { %s1259_s20 = scalar_lea.vmem %s32_s12, 256  ;;  %p1264_p12 = scmp.lt.s32.totalorder %s32_s12, %s32_s12 }
  0x1b   :  { %p1260_p11 = scmp.ne.s32.totalorder %s32_s12, %s1259_s20  ;;  %p1265_p13 = scmp.lt.s32.totalorder %s1259_s20, %s1259_s20 }
  0x1d   :  { %p1266_p0 = por %p1265_p13, %p1264_p12 }
  0x1f   :  { %p1267_p1 = pnand %p1266_p0, %p1260_p11 }
  0x21   :  { %1270 = shalt.err (!%p1267_p1)
}
  0x22   :  { %37 = dma.hbm_to_vmem [thread:$0]  %s1514_s1, 256, %s32_s12, [#allocation8], %s1300_s7, %s1300_s7, %s1301_s8  }
  0x23   :  { %1293 = dma.done.wait [#allocation5], 256  }
  0x24   :  { %1294 = vsyncadd [#allocation5], 4294967040 }
  0x25   :  { %1295 = dma.done.wait [#allocation8], 256  }
  0x26   :  { %1296 = vsyncadd [#allocation8], 4294967040  ;;  %v1303_v0 = vmov 0.0|0.0   ;;  %vm1304_vm0 = vmmov 0   ;;  %v1305_v1 = vmov 0.0   ;;  %vm56_vm1 = vcmask 254976  }
  0x27   :  { %1163 = vmatprep.subr.bf16.mxu1 %v1303_v0  ;;  %1068 = vmatprep.mubr.msk.f32.mxu1 %vm1304_vm0, %v1305_v1  ;;  %57 = vst.msk [vmem:[#allocation2] sm:$0x3] %vm56_vm1, %v1305_v1  ;;  %vm69_vm2 = vcmask 130048   ;;  %v60_v2 = vld [vmem:[#allocation7] sm:$0xff]  ;;  %v61_v3 = vld [vmem:[#allocation7 + $0x8] sm:$0xff]  ;;  %v58_v4 = vld [vmem:[#allocation4] sm:$0xff] }
  0x28   :  { %v1159_v5 = vpack.c.bf16 %v61_v3, %v60_v2  ;;  %1057 = vmatprep.mubr.msk.f32.mxu0 %vm69_vm2, %v58_v4  ;;  %v154_v6 = vld [vmem:[%s1515_s2] sm:$0xff]  ;;  %v155_v7 = vld [vmem:[%s1515_s2 + $0x8] sm:$0xff]  ;;  %v156_v9 = vld [vmem:[%s1515_s2 + $0x10] sm:$0xff]  ;;  %vm151_vm3 = vcmask 261120   ;;  %vm245_vm4 = vcmask 1041409   ;;  %vm842_vm5 = vcmask 1040384  }
  0x29   :  { %v1383_v8 = vpack.c.bf16 %v155_v7, %v154_v6  ;;  %v157_v10 = vld [vmem:[%s1515_s2 + $0x18] sm:$0xff]  ;;  %v989_v14 = vld [vmem:[%s1516_s3] ss:$0 sm:$0xff]  ;;  %vm845_vm6 = vcmask 1041408   ;;  %vm848_vm7 = vcmask 1042432   ;;  %vm851_vm8 = vcmask 1043456  }
  0x2a   :  { %1160 = vmatprep.subr.bf16.mxu0 %v1159_v5  ;;  %v59_v11 = vld [vmem:[#allocation4 + $0x8] sm:$0xff]  ;;  %v1392_v12 = vpack.c.bf16 %v157_v10, %v156_v9  ;;  %vm854_vm9 = vcmask 1044480   ;;  %vm857_vm10 = vcmask 1045504   ;;  %vm860_vm11 = vcmask 1046528   ;;  %s1306_s16 = smov [#allocation9]  }
  0x2b   :  { %1162 = vmatpush3.bf16.msra.mxu0 %v1159_v5  ;;  %1165 = vmatpush3.bf16.msra.mxu1 %v1383_v8  ;;  %vm870_vm12 = vcmask 261127   ;;  %vm872_vm13 = vcmask 253952   ;;  %s976_s17 = sshll.u32 %s1306_s16, 4  ;;  %vm968_vm14 = vcmask 64512   ;;  %s977_s17 = int_to_ptr.vmem [resolvable:$true] %s976_s17 }
  0x2c   :  { %1166 = vmatprep.subr.bf16.mxu1 %v1303_v0  ;;  %1169 = vmatprep.subr.bf16.mxu0 %v1303_v0  ;;  %s1271_s18 = scalar_lea.vmem %s977_s17, 256  ;;  %p1276_p3 = scmp.lt.s32.totalorder %s977_s17, %s977_s17 }
  0x2d   :  { %p1272_p2 = scmp.ne.s32.totalorder %s977_s17, %s1271_s18  ;;  %p1277_p4 = scmp.lt.s32.totalorder %s1271_s18, %s1271_s18 }
  0x2e   :  { %1058 = vmatmul.mubr.msk.f32.vlgmr.msra.gmra.mrb[0].mxu0 %vm69_vm2, %v59_v11  ;;  %v158_v13 = vld [vmem:[#allocation2] sm:$0x3] }
  0x2f   :  { %1168 = vmatpush3.bf16.msra.mxu1 %v1392_v12  ;;  %1171 = vmatpush3.bf16.msra.mxu0 %v1383_v8  ;;  %p1278_p5 = por %p1277_p4, %p1276_p3 }
  0x30   :  { %1172 = vmatprep.subr.bf16.mxu0 %v1303_v0  ;;  %1079 = vmatprep.mubr.msk.f32.mxu0 %vm1304_vm0, %v1305_v1 }
  0x31   :  { %1175 = vmatprep.subr.bf16.mxu1 %v1303_v0  ;;  %p1279_p6 = pnand %p1278_p5, %p1272_p2 }
  0x32   :  { %1069 = vmatmul.mubr.msk.f32.vlgmr.msra.gmra.mrb[0].mxu1 %vm151_vm3, %v158_v13 }
  0x33   :  { %1174 = vmatpush3.bf16.msra.mxu0 %v1392_v12  ;;  %1177 = vmatpush3.bf16.msra.mxu1 %v1383_v8 }
  0x34   :  { %1178 = vmatprep.subr.bf16.mxu1 %v1303_v0  ;;  %1090 = vmatprep.mubr.msk.f32.mxu1 %vm1304_vm0, %v1305_v1 }
  0x35   :  { %1181 = vmatprep.subr.bf16.mxu0 %v1303_v0 }
  0x37   :  { %1180 = vmatpush3.bf16.msra.mxu1 %v1392_v12 }
  0x38   :  { %1187 = vmatprep.subr.bf16.mxu1 %v1303_v0 }
 0x101   :  { %v1059_v15 = vpop.f32.mrb[0].mxu0 }
 0x102   :  { %v148_v16 = vadd.f32 %v1059_v15, %v989_v14  ;;  %v142_v17 = vpop.f32.mrb[1].mxu0 }
 0x103   :  { %v143_v18 = vadd.f32 %v989_v14, %v142_v17 }
 0x104   :  { %153 = vst.msk [vmem:[#allocation3 + $0x8] sm:$0xff] %vm151_vm3, %v148_v16 }
 0x105   :  { %152 = vst.msk [vmem:[#allocation3] sm:$0xff] %vm151_vm3, %v143_v18  ;;  %v230_v19 = vpop.f32.mrb[0].mxu1 }
 0x106   :  { %v1070_v20 = vpop.f32.mrb[1].mxu1  ;;  %v235_v21 = vrot.slane %v230_v19, 1 }
 0x10b   :  { %v1417_v22 = vld [vmem:[#allocation3 + $0x8] sm:$0xff] }
 0x10c   :  { %v1419_v23 = vld [vmem:[#allocation3] sm:$0xff]  ;;  %v239_v24 = vadd.f32 %v235_v21, %v1417_v22 }
 0x10d   :  { %v238_v25 = vadd.f32 %v230_v19, %v1419_v23 }
 0x10e   :  { %v241_v26 = vmax.f32 %v239_v24, 0.0 }
 0x10f   :  { %v240_v27 = vmax.f32 %v238_v25, 0.0 }
 0x110   :  { %v244_v28 = vrot.slane %v241_v26, 7 }
 0x112   :  { %v246_v29 = vsel %vm245_vm4, %v244_v28, %v240_v27 }
 0x113   :  { %1080 = vmatmul.mubr.msk.f32.vlgmr.msra.gmra.mrb[2].mxu0 %vm151_vm3, %v246_v29 }
 0x114   :  { %1183 = vmatpush3.bf16.msra.mxu0 %v1383_v8  ;;  %1101 = vmatprep.mubr.msk.f32.mxu0 %vm1304_vm0, %v1305_v1 }
 0x115   :  { %1184 = vmatprep.subr.bf16.mxu0 %v1303_v0 }
 0x118   :  { %1186 = vmatpush3.bf16.msra.mxu0 %v1392_v12 }
 0x119   :  { %1193 = vmatprep.subr.bf16.mxu0 %v1303_v0 }
 0x1e6   :  { %v315_v30 = vpop.f32.mrb[2].mxu0 }
 0x1e7   :  { %v320_v31 = vrot.slane %v315_v30, 7  ;;  %v1081_v32 = vpop.f32.mrb[3].mxu0  ;;  %v324_v34 = vadd.f32 %v315_v30, %v1417_v22 }
 0x1e9   :  { %v323_v33 = vadd.f32 %v320_v31, %v1419_v23  ;;  %v326_v36 = vmax.f32 %v324_v34, 0.0 }
 0x1eb   :  { %v325_v35 = vmax.f32 %v323_v33, 0.0  ;;  %v844_v48 = vsel %vm842_vm5, %v241_v26, %v326_v36 }
 0x1ed   :  { %v329_v37 = vrot.slane %v325_v35, 1  ;;  %v843_v47 = vsel %vm842_vm5, %v240_v27, %v325_v35 }
 0x1ef   :  { %v330_v38 = vsel %vm245_vm4, %v326_v36, %v329_v37 }
 0x1f0   :  { %1091 = vmatmul.mubr.msk.f32.vlgmr.msra.gmra.mrb[2].mxu1 %vm151_vm3, %v330_v38 }
 0x1f1   :  { %1189 = vmatpush3.bf16.msra.mxu1 %v1383_v8  ;;  %1112 = vmatprep.mubr.msk.f32.mxu1 %vm1304_vm0, %v1305_v1 }
 0x1f2   :  { %1190 = vmatprep.subr.bf16.mxu1 %v1303_v0 }
 0x1f5   :  { %1192 = vmatpush3.bf16.msra.mxu1 %v1392_v12 }
 0x1f6   :  { %1199 = vmatprep.subr.bf16.mxu1 %v1303_v0 }
 0x2c3   :  { %v399_v39 = vpop.f32.mrb[2].mxu1 }
 0x2c4   :  { %v404_v40 = vrot.slane %v399_v39, 6  ;;  %v405_v41 = vrot.slane %v399_v39, 7  ;;  %v1092_v42 = vpop.f32.mrb[3].mxu1 }
 0x2c6   :  { %v408_v43 = vadd.f32 %v404_v40, %v1419_v23  ;;  %v409_v44 = vadd.f32 %v405_v41, %v1417_v22 }
 0x2c8   :  { %v410_v45 = vmax.f32 %v408_v43, 0.0  ;;  %v411_v46 = vmax.f32 %v409_v44, 0.0  ;;  %v876_v44 = vld [vmem:[%s1517_s4] sm:$0xff] }
 0x2ca   :  { %v414_v49 = vrot.slane %v410_v45, 2  ;;  %v415_v50 = vrot.slane %v411_v46, 1  ;;  %v846_v51 = vsel %vm845_vm6, %v843_v47, %v410_v45  ;;  %v847_v52 = vsel %vm845_vm6, %v844_v48, %v411_v46  ;;  %v877_v45 = vld [vmem:[%s1517_s4 + $0x8] sm:$0xff]  ;;  %v878_v47 = vld [vmem:[%s1517_s4 + $0x10] sm:$0xff]  ;;  %v879_v48 = vld [vmem:[%s1517_s4 + $0x18] sm:$0xff] }
 0x2cb   :  { %v1211_v46 = vpack.c.bf16 %v877_v45, %v876_v44 }
 0x2cc   :  { %v416_v53 = vsel %vm245_vm4, %v415_v50, %v414_v49  ;;  %v1215_v49 = vpack.c.bf16 %v879_v48, %v878_v47 }
 0x2cd   :  { %1102 = vmatmul.mubr.msk.f32.vlgmr.msra.gmra.mrb[4].mxu0 %vm151_vm3, %v416_v53 }
 0x2ce   :  { %1195 = vmatpush3.bf16.msra.mxu0 %v1383_v8  ;;  %1123 = vmatprep.mubr.msk.f32.mxu0 %vm1304_vm0, %v1305_v1 }
 0x2cf   :  { %1196 = vmatprep.subr.bf16.mxu0 %v1303_v0 }
 0x2d2   :  { %1198 = vmatpush3.bf16.msra.mxu0 %v1392_v12 }
 0x2d3   :  { %1205 = vmatprep.subr.bf16.mxu0 %v1303_v0 }
 0x3a0   :  { %v485_v54 = vpop.f32.mrb[4].mxu0 }
 0x3a1   :  { %v490_v55 = vrot.slane %v485_v54, 5  ;;  %v491_v56 = vrot.slane %v485_v54, 6  ;;  %v1103_v57 = vpop.f32.mrb[5].mxu0 }
 0x3a3   :  { %v494_v58 = vadd.f32 %v490_v55, %v1419_v23  ;;  %v495_v59 = vadd.f32 %v491_v56, %v1417_v22 }
 0x3a5   :  { %v496_v60 = vmax.f32 %v494_v58, 0.0  ;;  %v497_v61 = vmax.f32 %v495_v59, 0.0 }
 0x3a7   :  { %v500_v62 = vrot.slane %v496_v60, 3  ;;  %v501_v63 = vrot.slane %v497_v61, 2  ;;  %v849_v2 = vsel %vm848_vm7, %v846_v51, %v496_v60  ;;  %v850_v3 = vsel %vm848_vm7, %v847_v52, %v497_v61 }
 0x3a9   :  { %v502_v4 = vsel %vm245_vm4, %v501_v63, %v500_v62 }
 0x3aa   :  { %1113 = vmatmul.mubr.msk.f32.vlgmr.msra.gmra.mrb[4].mxu1 %vm151_vm3, %v502_v4 }
 0x3ab   :  { %1201 = vmatpush3.bf16.msra.mxu1 %v1383_v8  ;;  %1134 = vmatprep.mubr.msk.f32.mxu1 %vm1304_vm0, %v1305_v1 }
 0x3ac   :  { %1202 = vmatprep.subr.bf16.mxu1 %v1303_v0 }
 0x3af   :  { %1204 = vmatpush3.bf16.msra.mxu1 %v1392_v12 }
 0x3b0   :  { %1212 = vmatprep.subr.bf16.mxu1 %v1211_v46 }
 0x47d   :  { %v571_v5 = vpop.f32.mrb[4].mxu1 }
 0x47e   :  { %v576_v6 = vrot.slane %v571_v5, 4  ;;  %v577_v7 = vrot.slane %v571_v5, 5  ;;  %v1114_v9 = vpop.f32.mrb[5].mxu1 }
 0x480   :  { %v580_v10 = vadd.f32 %v576_v6, %v1419_v23  ;;  %v581_v11 = vadd.f32 %v577_v7, %v1417_v22 }
 0x482   :  { %v582_v13 = vmax.f32 %v580_v10, 0.0  ;;  %v583_v14 = vmax.f32 %v581_v11, 0.0 }
 0x484   :  { %v586_v15 = vrot.slane %v582_v13, 4  ;;  %v587_v16 = vrot.slane %v583_v14, 3  ;;  %v852_v17 = vsel %vm851_vm8, %v849_v2, %v582_v13  ;;  %v853_v18 = vsel %vm851_vm8, %v850_v3, %v583_v14 }
 0x486   :  { %v588_v19 = vsel %vm245_vm4, %v587_v16, %v586_v15 }
 0x487   :  { %1124 = vmatmul.mubr.msk.f32.vlgmr.msra.gmra.mrb[6].mxu0 %vm151_vm3, %v588_v19 }
 0x488   :  { %1207 = vmatpush3.bf16.msra.mxu0 %v1383_v8  ;;  %1145 = vmatprep.mubr.msk.f32.mxu0 %vm1304_vm0, %v1305_v1 }
 0x489   :  { %1208 = vmatprep.subr.bf16.mxu0 %v1303_v0 }
 0x48c   :  { %1210 = vmatpush3.bf16.msra.mxu0 %v1392_v12 }
 0x55a   :  { %v657_v20 = vpop.f32.mrb[6].mxu0 }
 0x55b   :  { %v662_v21 = vrot.slane %v657_v20, 3  ;;  %v663_v24 = vrot.slane %v657_v20, 4  ;;  %v1125_v25 = vpop.f32.mrb[7].mxu0 }
 0x55d   :  { %v666_v26 = vadd.f32 %v662_v21, %v1419_v23  ;;  %v667_v27 = vadd.f32 %v663_v24, %v1417_v22 }
 0x55f   :  { %v668_v28 = vmax.f32 %v666_v26, 0.0  ;;  %v669_v29 = vmax.f32 %v667_v27, 0.0 }
 0x561   :  { %v672_v30 = vrot.slane %v668_v28, 5  ;;  %v673_v8 = vrot.slane %v669_v29, 4  ;;  %v855_v31 = vsel %vm854_vm9, %v852_v17, %v668_v28  ;;  %v856_v32 = vsel %vm854_vm9, %v853_v18, %v669_v29 }
 0x563   :  { %v674_v1 = vsel %vm245_vm4, %v673_v8, %v672_v30 }
 0x564   :  { %1135 = vmatmul.mubr.msk.f32.vlgmr.msra.gmra.mrb[6].mxu1 %vm151_vm3, %v674_v1 }
 0x565   :  { %1214 = vmatpush3.bf16.msra.mxu1 %v1211_v46 }
 0x566   :  { %1216 = vmatprep.subr.bf16.mxu1 %v1215_v49 }
 0x569   :  { %1218 = vmatpush3.bf16.msra.mxu1 %v1215_v49 }
 0x637   :  { %v743_v0 = vpop.f32.mrb[6].mxu1 }
 0x638   :  { %v748_v12 = vrot.slane %v743_v0, 2  ;;  %v749_v33 = vrot.slane %v743_v0, 3  ;;  %v1136_v34 = vpop.f32.mrb[7].mxu1 }
 0x63a   :  { %v752_v35 = vadd.f32 %v748_v12, %v1419_v23  ;;  %v753_v36 = vadd.f32 %v749_v33, %v1417_v22 }
 0x63c   :  { %v754_v37 = vmax.f32 %v752_v35, 0.0  ;;  %v755_v38 = vmax.f32 %v753_v36, 0.0 }
 0x63e   :  { %v758_v39 = vrot.slane %v754_v37, 6  ;;  %v759_v40 = vrot.slane %v755_v38, 5  ;;  %v858_v41 = vsel %vm857_vm10, %v855_v31, %v754_v37  ;;  %v859_v42 = vsel %vm857_vm10, %v856_v32, %v755_v38 }
 0x640   :  { %v760_v43 = vsel %vm245_vm4, %v759_v40, %v758_v39 }
 0x641   :  { %1146 = vmatmul.mubr.msk.f32.vlgmr.msra.gmra.mrb[8].mxu0 %vm151_vm3, %v760_v43 }
 0x714   :  { %v829_v50 = vpop.f32.mrb[8].mxu0 }
 0x715   :  { %v834_v51 = vrot.slane %v829_v50, 1  ;;  %v835_v52 = vrot.slane %v829_v50, 2  ;;  %v1147_v53 = vpop.f32.mrb[9].mxu0 }
 0x717   :  { %v838_v54 = vadd.f32 %v834_v51, %v1419_v23  ;;  %v839_v55 = vadd.f32 %v835_v52, %v1417_v22  ;;  %v1000_v22 = vld [vmem:[%s1518_s5] ss:$0 sm:$0xff] }
 0x719   :  { %v840_v56 = vmax.f32 %v838_v54, 0.0  ;;  %v841_v57 = vmax.f32 %v839_v55, 0.0 }
 0x71b   :  { %v861_v58 = vsel %vm860_vm11, %v858_v41, %v840_v56  ;;  %v862_v59 = vsel %vm860_vm11, %v859_v42, %v841_v57  ;;  %v867_v60 = vrot.slane %v841_v57, 7  ;;  %871 = vst.msk [vmem:[#allocation2 - $0x7] sm:$0x80] %vm870_vm12, %v840_v56 }
 0x71c   :  { %863 = vst.msk [vmem:[#allocation3] sm:$0xff] %vm151_vm3, %v861_v58  ;;  %864 = vst.msk [vmem:[#allocation3 + $0x8] sm:$0xff] %vm151_vm3, %v862_v59 }
 0x71d   :  { %873 = vst.msk [vmem:[#allocation2 + $0x1] sm:$0x1] %vm872_vm13, %v867_v60 }
 0x723   :  { %v874_v61 = vld [vmem:[#allocation3] sm:$0xff]  ;;  %v875_v62 = vld [vmem:[#allocation3 + $0x8] sm:$0xff] }
 0x724   :  { %1156 = vmatprep.mubr.msk.f32.mxu1 %vm151_vm3, %v874_v61 }
 0x725   :  { %1157 = vmatmul.mubr.msk.f32.vlgmr.msra.gmra.mrb[8].mxu1 %vm151_vm3, %v875_v62 }
 0x7f8   :  { %v1158_v23 = vpop.f32.mrb[8].mxu1 }
 0x7f9   :  { %v965_v63 = vadd.f32 %v1158_v23, %v1000_v22  ;;  %v959_v2 = vpop.f32.mrb[9].mxu1 }
 0x7fa   :  { %v960_v3 = vadd.f32 %v1000_v22, %v959_v2 }
 0x7fb   :  { %970 = vst.msk [vmem:[#allocation9 + $0x8] sm:$0xff] %vm968_vm14, %v965_v63 }
 0x7fc   :  { %969 = vst.msk [vmem:[#allocation9] sm:$0xff] %vm968_vm14, %v960_v3 }
 0x7fd   :  { %1282 = shalt.err (!%p1279_p6)
}
 0x7fe   :  { %s1283_s5 = scalar_lea.hbm %s1519_s6, 256 }
 0x7ff   :  { %p1284_p7 = scmp.ne.s32.totalorder %s1519_s6, %s1283_s5  ;;  %p1287_p8 = scmp.lt.u32.totalorder %s1283_s5, %s1519_s6 }
 0x801   :  { %p1289_p9 = pnand %p1287_p8, %p1284_p7 }
 0x803   :  { %1292 = shalt.err (!%p1289_p9)
}
 0x804   :  { %982 = dma.vmem_to_hbm [thread:$0]  %s977_s17, 256, %s1519_s6, [#allocation6], %s1300_s7, %s1300_s7, %s1301_s8  }
 0x805   :  { %1297 = dma.done.wait [#allocation6], 256  }
 0x806   :  { %1298 = vsyncadd [#allocation6], 4294967040 }
 0x807   :  { %986 = vsyncpa [#allocation5], 1 }
 0x808   :  { %987 = vsyncpa [#allocation8], 1 }
 0x809   :  { %988 = vsyncpa [#allocation6], 1 }

</bundles_post_ra>
